<compile_context>
chip_gen: v6e
topology: v6e:2x2x1
jax: 0.10.0
libtpu: 0.0.40
codegen_flags: <defaults>
</compile_context>

<pallas_src>
import functools

import jax
import jax.numpy as jnp
from jax.experimental import pallas as pl
from jax.experimental.pallas import tpu as pltpu

LANES = 128  # lane width / channel padding for every matmul N dim


# ---------------------------------------------------------------- utilities

def _round_up(n, m):
    return ((n + m - 1) // m) * m


def _pad_axis_to(x, size, axis):
    pad = size - x.shape[axis]
    if pad <= 0:
        return x
    widths = [(0, 0)] * x.ndim
    widths[axis] = (0, pad)
    return jnp.pad(x, widths)


def _im2col(x_nhwc, KH, KW):
    """(B,H,W,C) -> (B, OH*OW, KH*KW*C); column order = tap-major, channel-minor."""
    B, H, W, C = x_nhwc.shape
    OH, OW = H - KH + 1, W - KW + 1
    taps = [x_nhwc[:, i:i + OH, j:j + OW, :] for i in range(KH) for j in range(KW)]
    col = jnp.concatenate(taps, axis=-1)                 # (B, OH, OW, KH*KW*C)
    return col.reshape(B, OH * OW, KH * KW * C), OH, OW


# ------------------------------ conv stage: matmul + bias + ReLU + maxpool(2)

def conv_mm_relu_pool_kernel(col_ref, w_ref, b_ref, o_ref, acc_ref, row_ref,
                             *, POH, POW):
    # col_ref: (1, OH*OW, Kp) bf16   K-packed patches for one image
    # w_ref  : (Kp, 128)     bf16    K-packed conv weights
    # b_ref  : (1, 128)      f32
    # o_ref  : (1, POH*POW, 128) f32 pooled output (flat, lane-dense)
    # acc_ref: (OH*OW, 128)  f32 scratch;  row_ref: (OH*OW//2, 128) f32 scratch
    y = jnp.dot(col_ref[0], w_ref[...], preferred_element_type=jnp.float32)
    acc_ref[...] = jnp.maximum(y + b_ref[...], 0.0)       # bias + ReLU (f32)

    # 2x2 / stride-2 max-pool.
    # Stage 1: horizontal (ow) pairs via two big stride-2 loads over the whole
    # slab -> row k of row_ref corresponds to (oh, pw) with k = oh*POW + pw.
    half = acc_ref.shape[0] // 2
    row_ref[...] = jnp.maximum(acc_ref[pl.ds(0, half, 2), :],
                               acc_ref[pl.ds(1, half, 2), :])
    # Stage 2: vertical (oh) pairs; one contiguous (POW,128) slab per pooled row.
    for ph in range(POH):
        top = row_ref[pl.ds((2 * ph) * POW, POW), :]
        bot = row_ref[pl.ds((2 * ph + 1) * POW, POW), :]
        o_ref[0, pl.ds(ph * POW, POW), :] = jnp.maximum(top, bot)


def conv_stage(col, w, b, *, OH, OW):
    """col:(B, OH*OW, Kp) bf16   w:(Kp, 128) bf16   b:(1, 128) f32."""
    B, M, Kp = col.shape
    assert M == OH * OW and OH % 2 == 0 and OW % 2 == 0
    POH, POW = OH // 2, OW // 2
    PM = POH * POW

    kern = functools.partial(conv_mm_relu_pool_kernel, POH=POH, POW=POW)
    flops = 2 * B * M * Kp * LANES
    bytes_accessed = (col.size * 2 + w.size * 2 + b.size * 4
                      + B * PM * LANES * 4)
    return pl.pallas_call(
        kern,
        out_shape=jax.ShapeDtypeStruct((B, PM, LANES), jnp.float32),
        grid=(B,),
        in_specs=[
            pl.BlockSpec((1, M, Kp), lambda bb: (bb, 0, 0)),
            pl.BlockSpec((Kp, LANES), lambda bb: (0, 0)),
            pl.BlockSpec((1, LANES), lambda bb: (0, 0)),
        ],
        out_specs=pl.BlockSpec((1, PM, LANES), lambda bb: (bb, 0, 0)),
        scratch_shapes=[pltpu.VMEM((M, LANES), jnp.float32),
                        pltpu.VMEM((M // 2, LANES), jnp.float32)],
        compiler_params=pltpu.CompilerParams(
            dimension_semantics=("parallel",)),
        cost_estimate=pl.CostEstimate(flops=flops, transcendentals=0,
                                      bytes_accessed=bytes_accessed),
    )(col, w, b)


# ----------------------------------------------------- fused FC tail kernel

def fc_fused_kernel(x_ref, w1_ref, b1_ref, w2_ref, b2_ref, w3_ref, b3_ref,
                    o_ref, *, apply_head):
    h = jnp.dot(x_ref[...], w1_ref[...], preferred_element_type=jnp.float32)
    h = jnp.maximum(h + b1_ref[...], 0.0)
    h = jnp.dot(h.astype(jnp.bfloat16), w2_ref[...],
                preferred_element_type=jnp.float32)
    h = jnp.maximum(h + b2_ref[...], 0.0)
    if apply_head:
        h = jnp.dot(h.astype(jnp.bfloat16), w3_ref[...],
                    preferred_element_type=jnp.float32)
        h = h + b3_ref[...]
    o_ref[...] = h


def fc_fused(x, w1, b1, w2, b2, w3, b3, *, apply_head):
    """x:(Bp, K) bf16 with Bp a multiple of TM, K a multiple of 128."""
    Bp, K = x.shape
    TM = min(64, Bp)          # >=2 grid steps once Bp >= 128 -> both v7x cores
    assert Bp % TM == 0 and K % 128 == 0
    kern = functools.partial(fc_fused_kernel, apply_head=apply_head)
    full = lambda i: (0, 0)
    flops = 2 * Bp * (K * LANES + 2 * LANES * LANES)
    bytes_accessed = (x.size * 2 + (w1.size + w2.size + w3.size) * 2
                      + (b1.size + b2.size + b3.size) * 4 + Bp * LANES * 4)
    return pl.pallas_call(
        kern,
        out_shape=jax.ShapeDtypeStruct((Bp, LANES), jnp.float32),
        grid=(Bp // TM,),
        in_specs=[
            pl.BlockSpec((TM, K), lambda i: (i, 0)),
            pl.BlockSpec((K, LANES), full), pl.BlockSpec((1, LANES), full),
            pl.BlockSpec((LANES, LANES), full), pl.BlockSpec((1, LANES), full),
            pl.BlockSpec((LANES, LANES), full), pl.BlockSpec((1, LANES), full),
        ],
        out_specs=pl.BlockSpec((TM, LANES), lambda i: (i, 0)),
        compiler_params=pltpu.CompilerParams(
            dimension_semantics=("parallel",)),
        cost_estimate=pl.CostEstimate(flops=flops, transcendentals=0,
                                      bytes_accessed=bytes_accessed),
    )(x, w1, b1, w2, b2, w3, b3)


# ------------------------------------------------------- params & weight prep

def init_params(key, input_channel, target_class_num):
    """PyTorch-layout parameters with PyTorch default (uniform) init, in f32."""
    def uni(k, shape, fan_in):
        bound = 1.0 / jnp.sqrt(jnp.float32(fan_in))
        return jax.random.uniform(k, shape, jnp.float32, -bound, bound)

    ks = jax.random.split(key, 10)
    p = {}
    p["conv1_w"] = uni(ks[0], (6, input_channel, 5, 5), input_channel * 25)
    p["conv1_b"] = uni(ks[1], (6,), input_channel * 25)
    p["conv2_w"] = uni(ks[2], (16, 6, 5, 5), 6 * 25)
    p["conv2_b"] = uni(ks[3], (16,), 6 * 25)
    p["fc1_w"] = uni(ks[4], (120, 16 * 5 * 5), 16 * 5 * 5)   # Linear: (out, in)
    p["fc1_b"] = uni(ks[5], (120,), 16 * 5 * 5)
    p["fc2_w"] = uni(ks[6], (84, 120), 120)
    p["fc2_b"] = uni(ks[7], (84,), 120)
    p["pred_w"] = uni(ks[8], (target_class_num, 84), 84)
    p["pred_b"] = uni(ks[9], (target_class_num,), 84)
    return p


def prepare_params(p):
    """One-time conversion to compact, K-packed, bf16 Pallas weights."""
    out = {}

    def conv_prep(w, b):       # w:(Cout,Cin,KH,KW) -> (Kp, 128) K-packed
        cout, cin, kh, kw = w.shape
        wk = jnp.transpose(w, (2, 3, 1, 0)).reshape(kh * kw * cin, cout)
        kp = _round_up(kh * kw * cin, LANES)
        wk = _pad_axis_to(_pad_axis_to(wk, kp, 0), LANES, 1)
        bp = _pad_axis_to(b, LANES, 0).reshape(1, LANES)
        return wk.astype(jnp.bfloat16), bp.astype(jnp.float32)

    out["conv1_w"], out["conv1_b"] = conv_prep(p["conv1_w"], p["conv1_b"])
    out["conv2_w"], out["conv2_b"] = conv_prep(p["conv2_w"], p["conv2_b"])

    # fc1: our compact feature order is (pooled position p = h*5+w, channel c)
    # -> index p*16 + c; absorb PyTorch's flatten(1) (c, h, w) ordering here.
    w1 = p["fc1_w"].reshape(120, 16, 5, 5)                   # (out, c, h, w)
    w1 = jnp.transpose(w1, (0, 2, 3, 1)).reshape(120, 400)   # (out, (h,w,c))
    w1 = jnp.transpose(w1)                                   # (400, 120)
    out["fc1_w"] = _pad_axis_to(_pad_axis_to(w1, 512, 0), LANES, 1).astype(jnp.bfloat16)
    out["fc1_b"] = _pad_axis_to(p["fc1_b"], LANES, 0).reshape(1, LANES)

    w2 = jnp.transpose(p["fc2_w"])                           # (120, 84)
    out["fc2_w"] = _pad_axis_to(_pad_axis_to(w2, LANES, 0), LANES, 1).astype(jnp.bfloat16)
    out["fc2_b"] = _pad_axis_to(p["fc2_b"], LANES, 0).reshape(1, LANES)

    w3 = jnp.transpose(p["pred_w"])                          # (84, num_classes)
    out["pred_w"] = _pad_axis_to(_pad_axis_to(w3, LANES, 0), LANES, 1).astype(jnp.bfloat16)
    out["pred_b"] = _pad_axis_to(p["pred_b"], LANES, 0).reshape(1, LANES)
    return out


# --------------------------------------------------------------- forward pass

def cnn_forward(prep, x, *, ignore_head=False, target_class_num=10):
    """x: NCHW float32, same semantics as the PyTorch module's forward()."""
    B, Cin, H, W = x.shape
    x_nhwc = jnp.transpose(x, (0, 2, 3, 1))                  # layout plumbing

    # --- conv1 + ReLU + pool ---
    col1, OH1, OW1 = _im2col(x_nhwc, 5, 5)                   # (B, 784, 25*Cin)
    col1 = _pad_axis_to(col1, prep["conv1_w"].shape[0], 2).astype(jnp.bfloat16)
    h1 = conv_stage(col1, prep["conv1_w"], prep["conv1_b"], OH=OH1, OW=OW1)
    PH1, PW1 = OH1 // 2, OW1 // 2                            # (B, 196, 128) f32

    # --- conv2 + ReLU + pool ---
    h1_img = h1.reshape(B, PH1, PW1, LANES)[..., :6]         # real 6 channels
    col2, OH2, OW2 = _im2col(h1_img, 5, 5)                   # (B, 100, 150)
    col2 = _pad_axis_to(col2, prep["conv2_w"].shape[0], 2).astype(jnp.bfloat16)
    h2 = conv_stage(col2, prep["conv2_w"], prep["conv2_b"], OH=OH2, OW=OW2)
    # h2: (B, 25, 128) f32, real channels 0..15

    # --- fused FC tail ---
    feat = h2[..., :16].reshape(B, 25 * 16)                  # compact (B, 400)
    Kfc = prep["fc1_w"].shape[0]                             # 512
    Bp = _round_up(max(B, 8), 64 if B > 64 else 8)
    featp = _pad_axis_to(_pad_axis_to(feat, Kfc, 1), Bp, 0).astype(jnp.bfloat16)
    out = fc_fused(featp, prep["fc1_w"], prep["fc1_b"],
                   prep["fc2_w"], prep["fc2_b"],
                   prep["pred_w"], prep["pred_b"],
                   apply_head=not ignore_head)               # (Bp, 128) f32
    ncols = 84 if ignore_head else target_class_num
    return out[:B, :ncols]


# ------------------------------------------------------- pure-JAX reference

def reference_forward(params, x, *, ignore_head=False):
    hp = jax.lax.Precision.HIGHEST

    def conv(x, w, b):
        y = jax.lax.conv_general_dilated(
            x, w, (1, 1), "VALID",
            dimension_numbers=("NCHW", "OIHW", "NCHW"), precision=hp)
        return y + b.reshape(1, -1, 1, 1)

    def pool(x):
        B, C, H, W = x.shape
        return x.reshape(B, C, H // 2, 2, W // 2, 2).max(axis=(3, 5))

    x = pool(jax.nn.relu(conv(x, params["conv1_w"], params["conv1_b"])))
    x = pool(jax.nn.relu(conv(x, params["conv2_w"], params["conv2_b"])))
    x = x.reshape(x.shape[0], -1)
    x = jax.nn.relu(jnp.dot(x, params["fc1_w"].T, precision=hp) + params["fc1_b"])
    x = jax.nn.relu(jnp.dot(x, params["fc2_w"].T, precision=hp) + params["fc2_b"])
    if not ignore_head:
        x = jnp.dot(x, params["pred_w"].T, precision=hp) + params["pred_b"]
    return x


# ------------------------------------------------------------------- main

if __name__ == "__main__":
    input_channel = 3
    target_class_num = 10
    ignore_head = False

    key = jax.random.PRNGKey(0)
    k_param, k_x = jax.random.split(key)
    params = init_params(k_param, input_channel, target_class_num)
    prep = prepare_params(params)

    # The module's flatten(16*5*5) implies 32x32 spatial input.
    x = jax.random.normal(k_x, (2, input_channel, 32, 32), jnp.float32)

    fwd = jax.jit(functools.partial(cnn_forward, ignore_head=ignore_head,
                                    target_class_num=target_class_num))
    out = fwd(prep, x)
    jax.block_until_ready(out)

    ref = reference_forward(params, x, ignore_head=ignore_head)
    assert out.shape == (2, 84 if ignore_head else target_class_num), out.shape
    assert out.dtype == jnp.float32
    # Tolerance accounts for bf16 MXU operands (f32 accumulation) in the kernels.
    max_err = float(jnp.max(jnp.abs(out - ref)))
    assert jnp.allclose(out, ref, rtol=3e-2, atol=3e-2), max_err
    print("KERNEL_OK")
</pallas_src>

<mosaic_0001>
module attributes {stable_mosaic.version = 11 : i64} {
  func.func @conv_mm_relu_pool_kernel(%arg0: i32, %arg1: memref<1x784x128xbf16, #tpu.memory_space<vmem>>, %arg2: memref<128x128xbf16, #tpu.memory_space<vmem>>, %arg3: memref<1x128xf32, #tpu.memory_space<vmem>>, %arg4: memref<1x196x128xf32, #tpu.memory_space<vmem>>, %arg5: memref<784x128xf32, #tpu.memory_space<vmem>>, %arg6: memref<392x128xf32, #tpu.memory_space<vmem>>) attributes {dimension_semantics = [#tpu.dimension_semantics<parallel>], iteration_bounds = array<i64: 2>, scalar_prefetch = 0 : i64, scratch_operands = 2 : i64, tpu.core_type = #tpu.core_type<tc>, window_params = [{transform_indices = @transform_0, window_bounds = array<i64: 1, 784, 128>}, {pipeline_mode = #tpu.pipeline_mode<synchronous>, transform_indices = @transform_1, window_bounds = array<i64: 128, 128>}, {pipeline_mode = #tpu.pipeline_mode<synchronous>, transform_indices = @transform_2, window_bounds = array<i64: 1, 128>}, {transform_indices = @transform_3, window_bounds = array<i64: 1, 196, 128>}]} {
    %c0 = arith.constant 0 : index
    %c0_0 = arith.constant 0 : index
    %c0_1 = arith.constant 0 : index
    %0 = vector.load %arg1[%c0, %c0_0, %c0_1] : memref<1x784x128xbf16, #tpu.memory_space<vmem>>, vector<1x784x128xbf16>
    %1 = vector.shape_cast %0 : vector<1x784x128xbf16> to vector<784x128xbf16>
    %c0_2 = arith.constant 0 : index
    %c0_3 = arith.constant 0 : index
    %2 = vector.load %arg2[%c0_2, %c0_3] : memref<128x128xbf16, #tpu.memory_space<vmem>>, vector<128x128xbf16>
    %cst = arith.constant dense<0.000000e+00> : vector<784x128xf32>
    %3 = tpu.matmul %1, %2, %cst {dimension_numbers = #tpu.dot_dimension_numbers<[1], [0], [0], [1], [0, 0, 1, 1], [], []>} : vector<784x128xbf16>, vector<128x128xbf16>, vector<784x128xf32> -> vector<784x128xf32>
    %c0_4 = arith.constant 0 : index
    %c0_5 = arith.constant 0 : index
    %4 = vector.load %arg3[%c0_4, %c0_5] : memref<1x128xf32, #tpu.memory_space<vmem>>, vector<1x128xf32>
    %5 = vector.broadcast %4 : vector<1x128xf32> to vector<784x128xf32>
    %6 = arith.addf %3, %5 : vector<784x128xf32>
    %cst_6 = arith.constant 0.000000e+00 : f32
    %7 = vector.broadcast %cst_6 : f32 to vector<784x128xf32>
    %8 = arith.maximumf %6, %7 : vector<784x128xf32>
    %c0_7 = arith.constant 0 : index
    %c0_8 = arith.constant 0 : index
    %9 = vector.load %arg5[%c0_7, %c0_8] : memref<784x128xf32, #tpu.memory_space<vmem>>, vector<784x128xf32>
    tpu.vector_store %arg5[%c0_7, %c0_8], %8 {strides = array<i32>} : memref<784x128xf32, #tpu.memory_space<vmem>>, vector<784x128xf32>,
    %c0_9 = arith.constant 0 : index
    %c0_10 = arith.constant 0 : index
    %10 = tpu.strided_load %arg5[%c0_9, %c0_10] {strides = array<i32: 2, 1>} : memref<784x128xf32, #tpu.memory_space<vmem>>, vector<392x128xf32>
    %c1 = arith.constant 1 : index
    %c0_11 = arith.constant 0 : index
    %11 = tpu.strided_load %arg5[%c1, %c0_11] {strides = array<i32: 2, 1>} : memref<784x128xf32, #tpu.memory_space<vmem>>, vector<392x128xf32>
    %12 = arith.maximumf %10, %11 : vector<392x128xf32>
    %c0_12 = arith.constant 0 : index
    %c0_13 = arith.constant 0 : index
    %13 = vector.load %arg6[%c0_12, %c0_13] : memref<392x128xf32, #tpu.memory_space<vmem>>, vector<392x128xf32>
    tpu.vector_store %arg6[%c0_12, %c0_13], %12 {strides = array<i32>} : memref<392x128xf32, #tpu.memory_space<vmem>>, vector<392x128xf32>,
    %c0_14 = arith.constant 0 : index
    %c0_15 = arith.constant 0 : index
    %14 = vector.load %arg6[%c0_14, %c0_15] : memref<392x128xf32, #tpu.memory_space<vmem>>, vector<14x128xf32>
    %c14 = arith.constant 14 : index
    %c0_16 = arith.constant 0 : index
    %15 = vector.load %arg6[%c14, %c0_16] : memref<392x128xf32, #tpu.memory_space<vmem>>, vector<14x128xf32>
    %16 = arith.maximumf %14, %15 : vector<14x128xf32>
    %c0_17 = arith.constant 0 : index
    %c0_18 = arith.constant 0 : index
    %c0_19 = arith.constant 0 : index
    %17 = vector.load %arg4[%c0_17, %c0_18, %c0_19] : memref<1x196x128xf32, #tpu.memory_space<vmem>>, vector<1x14x128xf32>
    %18 = vector.shape_cast %17 : vector<1x14x128xf32> to vector<14x128xf32>
    %19 = vector.shape_cast %16 : vector<14x128xf32> to vector<1x14x128xf32>
    tpu.vector_store %arg4[%c0_17, %c0_18, %c0_19], %19 {strides = array<i32>} : memref<1x196x128xf32, #tpu.memory_space<vmem>>, vector<1x14x128xf32>,
    %c28 = arith.constant 28 : index
    %c0_20 = arith.constant 0 : index
    %20 = vector.load %arg6[%c28, %c0_20] : memref<392x128xf32, #tpu.memory_space<vmem>>, vector<14x128xf32>
    %c42 = arith.constant 42 : index
    %c0_21 = arith.constant 0 : index
    %21 = vector.load %arg6[%c42, %c0_21] : memref<392x128xf32, #tpu.memory_space<vmem>>, vector<14x128xf32>
    %22 = arith.maximumf %20, %21 : vector<14x128xf32>
    %c0_22 = arith.constant 0 : index
    %c14_23 = arith.constant 14 : index
    %c0_24 = arith.constant 0 : index
    %23 = vector.load %arg4[%c0_22, %c14_23, %c0_24] : memref<1x196x128xf32, #tpu.memory_space<vmem>>, vector<1x14x128xf32>
    %24 = vector.shape_cast %23 : vector<1x14x128xf32> to vector<14x128xf32>
    %25 = vector.shape_cast %22 : vector<14x128xf32> to vector<1x14x128xf32>
    tpu.vector_store %arg4[%c0_22, %c14_23, %c0_24], %25 {strides = array<i32>} : memref<1x196x128xf32, #tpu.memory_space<vmem>>, vector<1x14x128xf32>,
    %c56 = arith.constant 56 : index
    %c0_25 = arith.constant 0 : index
    %26 = vector.load %arg6[%c56, %c0_25] : memref<392x128xf32, #tpu.memory_space<vmem>>, vector<14x128xf32>
    %c70 = arith.constant 70 : index
    %c0_26 = arith.constant 0 : index
    %27 = vector.load %arg6[%c70, %c0_26] : memref<392x128xf32, #tpu.memory_space<vmem>>, vector<14x128xf32>
    %28 = arith.maximumf %26, %27 : vector<14x128xf32>
    %c0_27 = arith.constant 0 : index
    %c28_28 = arith.constant 28 : index
    %c0_29 = arith.constant 0 : index
    %29 = vector.load %arg4[%c0_27, %c28_28, %c0_29] : memref<1x196x128xf32, #tpu.memory_space<vmem>>, vector<1x14x128xf32>
    %30 = vector.shape_cast %29 : vector<1x14x128xf32> to vector<14x128xf32>
    %31 = vector.shape_cast %28 : vector<14x128xf32> to vector<1x14x128xf32>
    tpu.vector_store %arg4[%c0_27, %c28_28, %c0_29], %31 {strides = array<i32>} : memref<1x196x128xf32, #tpu.memory_space<vmem>>, vector<1x14x128xf32>,
    %c84 = arith.constant 84 : index
    %c0_30 = arith.constant 0 : index
    %32 = vector.load %arg6[%c84, %c0_30] : memref<392x128xf32, #tpu.memory_space<vmem>>, vector<14x128xf32>
    %c98 = arith.constant 98 : index
    %c0_31 = arith.constant 0 : index
    %33 = vector.load %arg6[%c98, %c0_31] : memref<392x128xf32, #tpu.memory_space<vmem>>, vector<14x128xf32>
    %34 = arith.maximumf %32, %33 : vector<14x128xf32>
    %c0_32 = arith.constant 0 : index
    %c42_33 = arith.constant 42 : index
    %c0_34 = arith.constant 0 : index
    %35 = vector.load %arg4[%c0_32, %c42_33, %c0_34] : memref<1x196x128xf32, #tpu.memory_space<vmem>>, vector<1x14x128xf32>
    %36 = vector.shape_cast %35 : vector<1x14x128xf32> to vector<14x128xf32>
    %37 = vector.shape_cast %34 : vector<14x128xf32> to vector<1x14x128xf32>
    tpu.vector_store %arg4[%c0_32, %c42_33, %c0_34], %37 {strides = array<i32>} : memref<1x196x128xf32, #tpu.memory_space<vmem>>, vector<1x14x128xf32>,
    %c112 = arith.constant 112 : index
    %c0_35 = arith.constant 0 : index
    %38 = vector.load %arg6[%c112, %c0_35] : memref<392x128xf32, #tpu.memory_space<vmem>>, vector<14x128xf32>
    %c126 = arith.constant 126 : index
    %c0_36 = arith.constant 0 : index
    %39 = vector.load %arg6[%c126, %c0_36] : memref<392x128xf32, #tpu.memory_space<vmem>>, vector<14x128xf32>
    %40 = arith.maximumf %38, %39 : vector<14x128xf32>
    %c0_37 = arith.constant 0 : index
    %c56_38 = arith.constant 56 : index
    %c0_39 = arith.constant 0 : index
    %41 = vector.load %arg4[%c0_37, %c56_38, %c0_39] : memref<1x196x128xf32, #tpu.memory_space<vmem>>, vector<1x14x128xf32>
    %42 = vector.shape_cast %41 : vector<1x14x128xf32> to vector<14x128xf32>
    %43 = vector.shape_cast %40 : vector<14x128xf32> to vector<1x14x128xf32>
    tpu.vector_store %arg4[%c0_37, %c56_38, %c0_39], %43 {strides = array<i32>} : memref<1x196x128xf32, #tpu.memory_space<vmem>>, vector<1x14x128xf32>,
    %c140 = arith.constant 140 : index
    %c0_40 = arith.constant 0 : index
    %44 = vector.load %arg6[%c140, %c0_40] : memref<392x128xf32, #tpu.memory_space<vmem>>, vector<14x128xf32>
    %c154 = arith.constant 154 : index
    %c0_41 = arith.constant 0 : index
    %45 = vector.load %arg6[%c154, %c0_41] : memref<392x128xf32, #tpu.memory_space<vmem>>, vector<14x128xf32>
    %46 = arith.maximumf %44, %45 : vector<14x128xf32>
    %c0_42 = arith.constant 0 : index
    %c70_43 = arith.constant 70 : index
    %c0_44 = arith.constant 0 : index
    %47 = vector.load %arg4[%c0_42, %c70_43, %c0_44] : memref<1x196x128xf32, #tpu.memory_space<vmem>>, vector<1x14x128xf32>
    %48 = vector.shape_cast %47 : vector<1x14x128xf32> to vector<14x128xf32>
    %49 = vector.shape_cast %46 : vector<14x128xf32> to vector<1x14x128xf32>
    tpu.vector_store %arg4[%c0_42, %c70_43, %c0_44], %49 {strides = array<i32>} : memref<1x196x128xf32, #tpu.memory_space<vmem>>, vector<1x14x128xf32>,
    %c168 = arith.constant 168 : index
    %c0_45 = arith.constant 0 : index
    %50 = vector.load %arg6[%c168, %c0_45] : memref<392x128xf32, #tpu.memory_space<vmem>>, vector<14x128xf32>
    %c182 = arith.constant 182 : index
    %c0_46 = arith.constant 0 : index
    %51 = vector.load %arg6[%c182, %c0_46] : memref<392x128xf32, #tpu.memory_space<vmem>>, vector<14x128xf32>
    %52 = arith.maximumf %50, %51 : vector<14x128xf32>
    %c0_47 = arith.constant 0 : index
    %c84_48 = arith.constant 84 : index
    %c0_49 = arith.constant 0 : index
    %53 = vector.load %arg4[%c0_47, %c84_48, %c0_49] : memref<1x196x128xf32, #tpu.memory_space<vmem>>, vector<1x14x128xf32>
    %54 = vector.shape_cast %53 : vector<1x14x128xf32> to vector<14x128xf32>
    %55 = vector.shape_cast %52 : vector<14x128xf32> to vector<1x14x128xf32>
    tpu.vector_store %arg4[%c0_47, %c84_48, %c0_49], %55 {strides = array<i32>} : memref<1x196x128xf32, #tpu.memory_space<vmem>>, vector<1x14x128xf32>,
    %c196 = arith.constant 196 : index
    %c0_50 = arith.constant 0 : index
    %56 = vector.load %arg6[%c196, %c0_50] : memref<392x128xf32, #tpu.memory_space<vmem>>, vector<14x128xf32>
    %c210 = arith.constant 210 : index
    %c0_51 = arith.constant 0 : index
    %57 = vector.load %arg6[%c210, %c0_51] : memref<392x128xf32, #tpu.memory_space<vmem>>, vector<14x128xf32>
    %58 = arith.maximumf %56, %57 : vector<14x128xf32>
    %c0_52 = arith.constant 0 : index
    %c98_53 = arith.constant 98 : index
    %c0_54 = arith.constant 0 : index
    %59 = vector.load %arg4[%c0_52, %c98_53, %c0_54] : memref<1x196x128xf32, #tpu.memory_space<vmem>>, vector<1x14x128xf32>
    %60 = vector.shape_cast %59 : vector<1x14x128xf32> to vector<14x128xf32>
    %61 = vector.shape_cast %58 : vector<14x128xf32> to vector<1x14x128xf32>
    tpu.vector_store %arg4[%c0_52, %c98_53, %c0_54], %61 {strides = array<i32>} : memref<1x196x128xf32, #tpu.memory_space<vmem>>, vector<1x14x128xf32>,
    %c224 = arith.constant 224 : index
    %c0_55 = arith.constant 0 : index
    %62 = vector.load %arg6[%c224, %c0_55] : memref<392x128xf32, #tpu.memory_space<vmem>>, vector<14x128xf32>
    %c238 = arith.constant 238 : index
    %c0_56 = arith.constant 0 : index
    %63 = vector.load %arg6[%c238, %c0_56] : memref<392x128xf32, #tpu.memory_space<vmem>>, vector<14x128xf32>
    %64 = arith.maximumf %62, %63 : vector<14x128xf32>
    %c0_57 = arith.constant 0 : index
    %c112_58 = arith.constant 112 : index
    %c0_59 = arith.constant 0 : index
    %65 = vector.load %arg4[%c0_57, %c112_58, %c0_59] : memref<1x196x128xf32, #tpu.memory_space<vmem>>, vector<1x14x128xf32>
    %66 = vector.shape_cast %65 : vector<1x14x128xf32> to vector<14x128xf32>
    %67 = vector.shape_cast %64 : vector<14x128xf32> to vector<1x14x128xf32>
    tpu.vector_store %arg4[%c0_57, %c112_58, %c0_59], %67 {strides = array<i32>} : memref<1x196x128xf32, #tpu.memory_space<vmem>>, vector<1x14x128xf32>,
    %c252 = arith.constant 252 : index
    %c0_60 = arith.constant 0 : index
    %68 = vector.load %arg6[%c252, %c0_60] : memref<392x128xf32, #tpu.memory_space<vmem>>, vector<14x128xf32>
    %c266 = arith.constant 266 : index
    %c0_61 = arith.constant 0 : index
    %69 = vector.load %arg6[%c266, %c0_61] : memref<392x128xf32, #tpu.memory_space<vmem>>, vector<14x128xf32>
    %70 = arith.maximumf %68, %69 : vector<14x128xf32>
    %c0_62 = arith.constant 0 : index
    %c126_63 = arith.constant 126 : index
    %c0_64 = arith.constant 0 : index
    %71 = vector.load %arg4[%c0_62, %c126_63, %c0_64] : memref<1x196x128xf32, #tpu.memory_space<vmem>>, vector<1x14x128xf32>
    %72 = vector.shape_cast %71 : vector<1x14x128xf32> to vector<14x128xf32>
    %73 = vector.shape_cast %70 : vector<14x128xf32> to vector<1x14x128xf32>
    tpu.vector_store %arg4[%c0_62, %c126_63, %c0_64], %73 {strides = array<i32>} : memref<1x196x128xf32, #tpu.memory_space<vmem>>, vector<1x14x128xf32>,
    %c280 = arith.constant 280 : index
    %c0_65 = arith.constant 0 : index
    %74 = vector.load %arg6[%c280, %c0_65] : memref<392x128xf32, #tpu.memory_space<vmem>>, vector<14x128xf32>
    %c294 = arith.constant 294 : index
    %c0_66 = arith.constant 0 : index
    %75 = vector.load %arg6[%c294, %c0_66] : memref<392x128xf32, #tpu.memory_space<vmem>>, vector<14x128xf32>
    %76 = arith.maximumf %74, %75 : vector<14x128xf32>
    %c0_67 = arith.constant 0 : index
    %c140_68 = arith.constant 140 : index
    %c0_69 = arith.constant 0 : index
    %77 = vector.load %arg4[%c0_67, %c140_68, %c0_69] : memref<1x196x128xf32, #tpu.memory_space<vmem>>, vector<1x14x128xf32>
    %78 = vector.shape_cast %77 : vector<1x14x128xf32> to vector<14x128xf32>
    %79 = vector.shape_cast %76 : vector<14x128xf32> to vector<1x14x128xf32>
    tpu.vector_store %arg4[%c0_67, %c140_68, %c0_69], %79 {strides = array<i32>} : memref<1x196x128xf32, #tpu.memory_space<vmem>>, vector<1x14x128xf32>,
    %c308 = arith.constant 308 : index
    %c0_70 = arith.constant 0 : index
    %80 = vector.load %arg6[%c308, %c0_70] : memref<392x128xf32, #tpu.memory_space<vmem>>, vector<14x128xf32>
    %c322 = arith.constant 322 : index
    %c0_71 = arith.constant 0 : index
    %81 = vector.load %arg6[%c322, %c0_71] : memref<392x128xf32, #tpu.memory_space<vmem>>, vector<14x128xf32>
    %82 = arith.maximumf %80, %81 : vector<14x128xf32>
    %c0_72 = arith.constant 0 : index
    %c154_73 = arith.constant 154 : index
    %c0_74 = arith.constant 0 : index
    %83 = vector.load %arg4[%c0_72, %c154_73, %c0_74] : memref<1x196x128xf32, #tpu.memory_space<vmem>>, vector<1x14x128xf32>
    %84 = vector.shape_cast %83 : vector<1x14x128xf32> to vector<14x128xf32>
    %85 = vector.shape_cast %82 : vector<14x128xf32> to vector<1x14x128xf32>
    tpu.vector_store %arg4[%c0_72, %c154_73, %c0_74], %85 {strides = array<i32>} : memref<1x196x128xf32, #tpu.memory_space<vmem>>, vector<1x14x128xf32>,
    %c336 = arith.constant 336 : index
    %c0_75 = arith.constant 0 : index
    %86 = vector.load %arg6[%c336, %c0_75] : memref<392x128xf32, #tpu.memory_space<vmem>>, vector<14x128xf32>
    %c350 = arith.constant 350 : index
    %c0_76 = arith.constant 0 : index
    %87 = vector.load %arg6[%c350, %c0_76] : memref<392x128xf32, #tpu.memory_space<vmem>>, vector<14x128xf32>
    %88 = arith.maximumf %86, %87 : vector<14x128xf32>
    %c0_77 = arith.constant 0 : index
    %c168_78 = arith.constant 168 : index
    %c0_79 = arith.constant 0 : index
    %89 = vector.load %arg4[%c0_77, %c168_78, %c0_79] : memref<1x196x128xf32, #tpu.memory_space<vmem>>, vector<1x14x128xf32>
    %90 = vector.shape_cast %89 : vector<1x14x128xf32> to vector<14x128xf32>
    %91 = vector.shape_cast %88 : vector<14x128xf32> to vector<1x14x128xf32>
    tpu.vector_store %arg4[%c0_77, %c168_78, %c0_79], %91 {strides = array<i32>} : memref<1x196x128xf32, #tpu.memory_space<vmem>>, vector<1x14x128xf32>,
    %c364 = arith.constant 364 : index
    %c0_80 = arith.constant 0 : index
    %92 = vector.load %arg6[%c364, %c0_80] : memref<392x128xf32, #tpu.memory_space<vmem>>, vector<14x128xf32>
    %c378 = arith.constant 378 : index
    %c0_81 = arith.constant 0 : index
    %93 = vector.load %arg6[%c378, %c0_81] : memref<392x128xf32, #tpu.memory_space<vmem>>, vector<14x128xf32>
    %94 = arith.maximumf %92, %93 : vector<14x128xf32>
    %c0_82 = arith.constant 0 : index
    %c182_83 = arith.constant 182 : index
    %c0_84 = arith.constant 0 : index
    %95 = vector.load %arg4[%c0_82, %c182_83, %c0_84] : memref<1x196x128xf32, #tpu.memory_space<vmem>>, vector<1x14x128xf32>
    %96 = vector.shape_cast %95 : vector<1x14x128xf32> to vector<14x128xf32>
    %97 = vector.shape_cast %94 : vector<14x128xf32> to vector<1x14x128xf32>
    tpu.vector_store %arg4[%c0_82, %c182_83, %c0_84], %97 {strides = array<i32>} : memref<1x196x128xf32, #tpu.memory_space<vmem>>, vector<1x14x128xf32>,
    return
  }
  func.func @transform_0(%arg0: i32) -> (i32, i32, i32) {
    %c0_i32 = arith.constant 0 : i32
    %c0_i32_0 = arith.constant 0 : i32
    %c0_i32_1 = arith.constant 0 : i32
    return %arg0, %c0_i32, %c0_i32_0 : i32, i32, i32
  }
  func.func @transform_1(%arg0: i32) -> (i32, i32) {
    %c0_i32 = arith.constant 0 : i32
    %c0_i32_0 = arith.constant 0 : i32
    %c0_i32_1 = arith.constant 0 : i32
    return %c0_i32, %c0_i32_0 : i32, i32
  }
  func.func @transform_2(%arg0: i32) -> (i32, i32) {
    %c0_i32 = arith.constant 0 : i32
    %c0_i32_0 = arith.constant 0 : i32
    %c0_i32_1 = arith.constant 0 : i32
    return %c0_i32, %c0_i32_0 : i32, i32
  }
  func.func @transform_3(%arg0: i32) -> (i32, i32, i32) {
    %c0_i32 = arith.constant 0 : i32
    %c0_i32_0 = arith.constant 0 : i32
    %c0_i32_1 = arith.constant 0 : i32
    return %arg0, %c0_i32, %c0_i32_0 : i32, i32, i32
  }
}

module attributes {stable_mosaic.version = 11 : i64} {
  func.func @fc_fused_kernel(%arg0: i32, %arg1: memref<8x512xbf16, #tpu.memory_space<vmem>>, %arg2: memref<512x128xbf16, #tpu.memory_space<vmem>>, %arg3: memref<1x128xf32, #tpu.memory_space<vmem>>, %arg4: memref<128x128xbf16, #tpu.memory_space<vmem>>, %arg5: memref<1x128xf32, #tpu.memory_space<vmem>>, %arg6: memref<128x128xbf16, #tpu.memory_space<vmem>>, %arg7: memref<1x128xf32, #tpu.memory_space<vmem>>, %arg8: memref<8x128xf32, #tpu.memory_space<vmem>>) attributes {dimension_semantics = [#tpu.dimension_semantics<parallel>], iteration_bounds = array<i64: 1>, scalar_prefetch = 0 : i64, scratch_operands = 0 : i64, tpu.core_type = #tpu.core_type<tc>, window_params = [{transform_indices = @transform_0, window_bounds = array<i64: 8, 512>}, {pipeline_mode = #tpu.pipeline_mode<synchronous>, transform_indices = @transform_1, window_bounds = array<i64: 512, 128>}, {pipeline_mode = #tpu.pipeline_mode<synchronous>, transform_indices = @transform_2, window_bounds = array<i64: 1, 128>}, {pipeline_mode = #tpu.pipeline_mode<synchronous>, transform_indices = @transform_3, window_bounds = array<i64: 128, 128>}, {pipeline_mode = #tpu.pipeline_mode<synchronous>, transform_indices = @transform_4, window_bounds = array<i64: 1, 128>}, {pipeline_mode = #tpu.pipeline_mode<synchronous>, transform_indices = @transform_5, window_bounds = array<i64: 128, 128>}, {pipeline_mode = #tpu.pipeline_mode<synchronous>, transform_indices = @transform_6, window_bounds = array<i64: 1, 128>}, {transform_indices = @transform_7, window_bounds = array<i64: 8, 128>}]} {
    %c0 = arith.constant 0 : index
    %c0_0 = arith.constant 0 : index
    %0 = vector.load %arg1[%c0, %c0_0] : memref<8x512xbf16, #tpu.memory_space<vmem>>, vector<8x512xbf16>
    %c0_1 = arith.constant 0 : index
    %c0_2 = arith.constant 0 : index
    %1 = vector.load %arg2[%c0_1, %c0_2] : memref<512x128xbf16, #tpu.memory_space<vmem>>, vector<512x128xbf16>
    %cst = arith.constant dense<0.000000e+00> : vector<8x128xf32>
    %2 = tpu.matmul %0, %1, %cst {dimension_numbers = #tpu.dot_dimension_numbers<[1], [0], [0], [1], [0, 0, 1, 1], [], []>} : vector<8x512xbf16>, vector<512x128xbf16>, vector<8x128xf32> -> vector<8x128xf32>
    %c0_3 = arith.constant 0 : index
    %c0_4 = arith.constant 0 : index
    %3 = vector.load %arg3[%c0_3, %c0_4] : memref<1x128xf32, #tpu.memory_space<vmem>>, vector<1x128xf32>
    %4 = vector.broadcast %3 : vector<1x128xf32> to vector<8x128xf32>
    %5 = arith.addf %2, %4 : vector<8x128xf32>
    %cst_5 = arith.constant 0.000000e+00 : f32
    %6 = vector.broadcast %cst_5 : f32 to vector<8x128xf32>
    %7 = arith.maximumf %5, %6 : vector<8x128xf32>
    %8 = arith.truncf %7 : vector<8x128xf32> to vector<8x128xbf16>
    %c0_6 = arith.constant 0 : index
    %c0_7 = arith.constant 0 : index
    %9 = vector.load %arg4[%c0_6, %c0_7] : memref<128x128xbf16, #tpu.memory_space<vmem>>, vector<128x128xbf16>
    %cst_8 = arith.constant dense<0.000000e+00> : vector<8x128xf32>
    %10 = tpu.matmul %8, %9, %cst_8 {dimension_numbers = #tpu.dot_dimension_numbers<[1], [0], [0], [1], [0, 0, 1, 1], [], []>} : vector<8x128xbf16>, vector<128x128xbf16>, vector<8x128xf32> -> vector<8x128xf32>
    %c0_9 = arith.constant 0 : index
    %c0_10 = arith.constant 0 : index
    %11 = vector.load %arg5[%c0_9, %c0_10] : memref<1x128xf32, #tpu.memory_space<vmem>>, vector<1x128xf32>
    %12 = vector.broadcast %11 : vector<1x128xf32> to vector<8x128xf32>
    %13 = arith.addf %10, %12 : vector<8x128xf32>
    %cst_11 = arith.constant 0.000000e+00 : f32
    %14 = vector.broadcast %cst_11 : f32 to vector<8x128xf32>
    %15 = arith.maximumf %13, %14 : vector<8x128xf32>
    %16 = arith.truncf %15 : vector<8x128xf32> to vector<8x128xbf16>
    %c0_12 = arith.constant 0 : index
    %c0_13 = arith.constant 0 : index
    %17 = vector.load %arg6[%c0_12, %c0_13] : memref<128x128xbf16, #tpu.memory_space<vmem>>, vector<128x128xbf16>
    %cst_14 = arith.constant dense<0.000000e+00> : vector<8x128xf32>
    %18 = tpu.matmul %16, %17, %cst_14 {dimension_numbers = #tpu.dot_dimension_numbers<[1], [0], [0], [1], [0, 0, 1, 1], [], []>} : vector<8x128xbf16>, vector<128x128xbf16>, vector<8x128xf32> -> vector<8x128xf32>
    %c0_15 = arith.constant 0 : index
    %c0_16 = arith.constant 0 : index
    %19 = vector.load %arg7[%c0_15, %c0_16] : memref<1x128xf32, #tpu.memory_space<vmem>>, vector<1x128xf32>
    %20 = vector.broadcast %19 : vector<1x128xf32> to vector<8x128xf32>
    %21 = arith.addf %18, %20 : vector<8x128xf32>
    %c0_17 = arith.constant 0 : index
    %c0_18 = arith.constant 0 : index
    %22 = vector.load %arg8[%c0_17, %c0_18] : memref<8x128xf32, #tpu.memory_space<vmem>>, vector<8x128xf32>
    tpu.vector_store %arg8[%c0_17, %c0_18], %21 {strides = array<i32>} : memref<8x128xf32, #tpu.memory_space<vmem>>, vector<8x128xf32>,
    return
  }
  func.func @transform_0(%arg0: i32) -> (i32, i32) {
    %c0_i32 = arith.constant 0 : i32
    %c0_i32_0 = arith.constant 0 : i32
    return %arg0, %c0_i32 : i32, i32
  }
  func.func @transform_1(%arg0: i32) -> (i32, i32) {
    %c0_i32 = arith.constant 0 : i32
    %c0_i32_0 = arith.constant 0 : i32
    %c0_i32_1 = arith.constant 0 : i32
    return %c0_i32, %c0_i32_0 : i32, i32
  }
  func.func @transform_2(%arg0: i32) -> (i32, i32) {
    %c0_i32 = arith.constant 0 : i32
    %c0_i32_0 = arith.constant 0 : i32
    %c0_i32_1 = arith.constant 0 : i32
    return %c0_i32, %c0_i32_0 : i32, i32
  }
  func.func @transform_3(%arg0: i32) -> (i32, i32) {
    %c0_i32 = arith.constant 0 : i32
    %c0_i32_0 = arith.constant 0 : i32
    %c0_i32_1 = arith.constant 0 : i32
    return %c0_i32, %c0_i32_0 : i32, i32
  }
  func.func @transform_4(%arg0: i32) -> (i32, i32) {
    %c0_i32 = arith.constant 0 : i32
    %c0_i32_0 = arith.constant 0 : i32
    %c0_i32_1 = arith.constant 0 : i32
    return %c0_i32, %c0_i32_0 : i32, i32
  }
  func.func @transform_5(%arg0: i32) -> (i32, i32) {
    %c0_i32 = arith.constant 0 : i32
    %c0_i32_0 = arith.constant 0 : i32
    %c0_i32_1 = arith.constant 0 : i32
    return %c0_i32, %c0_i32_0 : i32, i32
  }
  func.func @transform_6(%arg0: i32) -> (i32, i32) {
    %c0_i32 = arith.constant 0 : i32
    %c0_i32_0 = arith.constant 0 : i32
    %c0_i32_1 = arith.constant 0 : i32
    return %c0_i32, %c0_i32_0 : i32, i32
  }
  func.func @transform_7(%arg0: i32) -> (i32, i32) {
    %c0_i32 = arith.constant 0 : i32
    %c0_i32_0 = arith.constant 0 : i32
    return %arg0, %c0_i32 : i32, i32
  }
}

module attributes {stable_mosaic.version = 11 : i64} {
  func.func @conv_mm_relu_pool_kernel(%arg0: i32, %arg1: memref<1x100x256xbf16, #tpu.memory_space<vmem>>, %arg2: memref<256x128xbf16, #tpu.memory_space<vmem>>, %arg3: memref<1x128xf32, #tpu.memory_space<vmem>>, %arg4: memref<1x25x128xf32, #tpu.memory_space<vmem>>, %arg5: memref<100x128xf32, #tpu.memory_space<vmem>>, %arg6: memref<50x128xf32, #tpu.memory_space<vmem>>) attributes {dimension_semantics = [#tpu.dimension_semantics<parallel>], iteration_bounds = array<i64: 2>, scalar_prefetch = 0 : i64, scratch_operands = 2 : i64, tpu.core_type = #tpu.core_type<tc>, window_params = [{transform_indices = @transform_0, window_bounds = array<i64: 1, 100, 256>}, {pipeline_mode = #tpu.pipeline_mode<synchronous>, transform_indices = @transform_1, window_bounds = array<i64: 256, 128>}, {pipeline_mode = #tpu.pipeline_mode<synchronous>, transform_indices = @transform_2, window_bounds = array<i64: 1, 128>}, {transform_indices = @transform_3, window_bounds = array<i64: 1, 25, 128>}]} {
    %c0 = arith.constant 0 : index
    %c0_0 = arith.constant 0 : index
    %c0_1 = arith.constant 0 : index
    %0 = vector.load %arg1[%c0, %c0_0, %c0_1] : memref<1x100x256xbf16, #tpu.memory_space<vmem>>, vector<1x100x256xbf16>
    %1 = vector.shape_cast %0 : vector<1x100x256xbf16> to vector<100x256xbf16>
    %c0_2 = arith.constant 0 : index
    %c0_3 = arith.constant 0 : index
    %2 = vector.load %arg2[%c0_2, %c0_3] : memref<256x128xbf16, #tpu.memory_space<vmem>>, vector<256x128xbf16>
    %cst = arith.constant dense<0.000000e+00> : vector<100x128xf32>
    %3 = tpu.matmul %1, %2, %cst {dimension_numbers = #tpu.dot_dimension_numbers<[1], [0], [0], [1], [0, 0, 1, 1], [], []>} : vector<100x256xbf16>, vector<256x128xbf16>, vector<100x128xf32> -> vector<100x128xf32>
    %c0_4 = arith.constant 0 : index
    %c0_5 = arith.constant 0 : index
    %4 = vector.load %arg3[%c0_4, %c0_5] : memref<1x128xf32, #tpu.memory_space<vmem>>, vector<1x128xf32>
    %5 = vector.broadcast %4 : vector<1x128xf32> to vector<100x128xf32>
    %6 = arith.addf %3, %5 : vector<100x128xf32>
    %cst_6 = arith.constant 0.000000e+00 : f32
    %7 = vector.broadcast %cst_6 : f32 to vector<100x128xf32>
    %8 = arith.maximumf %6, %7 : vector<100x128xf32>
    %c0_7 = arith.constant 0 : index
    %c0_8 = arith.constant 0 : index
    %9 = vector.load %arg5[%c0_7, %c0_8] : memref<100x128xf32, #tpu.memory_space<vmem>>, vector<100x128xf32>
    tpu.vector_store %arg5[%c0_7, %c0_8], %8 {strides = array<i32>} : memref<100x128xf32, #tpu.memory_space<vmem>>, vector<100x128xf32>,
    %c0_9 = arith.constant 0 : index
    %c0_10 = arith.constant 0 : index
    %10 = tpu.strided_load %arg5[%c0_9, %c0_10] {strides = array<i32: 2, 1>} : memref<100x128xf32, #tpu.memory_space<vmem>>, vector<50x128xf32>
    %c1 = arith.constant 1 : index
    %c0_11 = arith.constant 0 : index
    %11 = tpu.strided_load %arg5[%c1, %c0_11] {strides = array<i32: 2, 1>} : memref<100x128xf32, #tpu.memory_space<vmem>>, vector<50x128xf32>
    %12 = arith.maximumf %10, %11 : vector<50x128xf32>
    %c0_12 = arith.constant 0 : index
    %c0_13 = arith.constant 0 : index
    %13 = vector.load %arg6[%c0_12, %c0_13] : memref<50x128xf32, #tpu.memory_space<vmem>>, vector<50x128xf32>
    tpu.vector_store %arg6[%c0_12, %c0_13], %12 {strides = array<i32>} : memref<50x128xf32, #tpu.memory_space<vmem>>, vector<50x128xf32>,
    %c0_14 = arith.constant 0 : index
    %c0_15 = arith.constant 0 : index
    %14 = vector.load %arg6[%c0_14, %c0_15] : memref<50x128xf32, #tpu.memory_space<vmem>>, vector<5x128xf32>
    %c5 = arith.constant 5 : index
    %c0_16 = arith.constant 0 : index
    %15 = vector.load %arg6[%c5, %c0_16] : memref<50x128xf32, #tpu.memory_space<vmem>>, vector<5x128xf32>
    %16 = arith.maximumf %14, %15 : vector<5x128xf32>
    %c0_17 = arith.constant 0 : index
    %c0_18 = arith.constant 0 : index
    %c0_19 = arith.constant 0 : index
    %17 = vector.load %arg4[%c0_17, %c0_18, %c0_19] : memref<1x25x128xf32, #tpu.memory_space<vmem>>, vector<1x5x128xf32>
    %18 = vector.shape_cast %17 : vector<1x5x128xf32> to vector<5x128xf32>
    %19 = vector.shape_cast %16 : vector<5x128xf32> to vector<1x5x128xf32>
    tpu.vector_store %arg4[%c0_17, %c0_18, %c0_19], %19 {strides = array<i32>} : memref<1x25x128xf32, #tpu.memory_space<vmem>>, vector<1x5x128xf32>,
    %c10 = arith.constant 10 : index
    %c0_20 = arith.constant 0 : index
    %20 = vector.load %arg6[%c10, %c0_20] : memref<50x128xf32, #tpu.memory_space<vmem>>, vector<5x128xf32>
    %c15 = arith.constant 15 : index
    %c0_21 = arith.constant 0 : index
    %21 = vector.load %arg6[%c15, %c0_21] : memref<50x128xf32, #tpu.memory_space<vmem>>, vector<5x128xf32>
    %22 = arith.maximumf %20, %21 : vector<5x128xf32>
    %c0_22 = arith.constant 0 : index
    %c5_23 = arith.constant 5 : index
    %c0_24 = arith.constant 0 : index
    %23 = vector.load %arg4[%c0_22, %c5_23, %c0_24] : memref<1x25x128xf32, #tpu.memory_space<vmem>>, vector<1x5x128xf32>
    %24 = vector.shape_cast %23 : vector<1x5x128xf32> to vector<5x128xf32>
    %25 = vector.shape_cast %22 : vector<5x128xf32> to vector<1x5x128xf32>
    tpu.vector_store %arg4[%c0_22, %c5_23, %c0_24], %25 {strides = array<i32>} : memref<1x25x128xf32, #tpu.memory_space<vmem>>, vector<1x5x128xf32>,
    %c20 = arith.constant 20 : index
    %c0_25 = arith.constant 0 : index
    %26 = vector.load %arg6[%c20, %c0_25] : memref<50x128xf32, #tpu.memory_space<vmem>>, vector<5x128xf32>
    %c25 = arith.constant 25 : index
    %c0_26 = arith.constant 0 : index
    %27 = vector.load %arg6[%c25, %c0_26] : memref<50x128xf32, #tpu.memory_space<vmem>>, vector<5x128xf32>
    %28 = arith.maximumf %26, %27 : vector<5x128xf32>
    %c0_27 = arith.constant 0 : index
    %c10_28 = arith.constant 10 : index
    %c0_29 = arith.constant 0 : index
    %29 = vector.load %arg4[%c0_27, %c10_28, %c0_29] : memref<1x25x128xf32, #tpu.memory_space<vmem>>, vector<1x5x128xf32>
    %30 = vector.shape_cast %29 : vector<1x5x128xf32> to vector<5x128xf32>
    %31 = vector.shape_cast %28 : vector<5x128xf32> to vector<1x5x128xf32>
    tpu.vector_store %arg4[%c0_27, %c10_28, %c0_29], %31 {strides = array<i32>} : memref<1x25x128xf32, #tpu.memory_space<vmem>>, vector<1x5x128xf32>,
    %c30 = arith.constant 30 : index
    %c0_30 = arith.constant 0 : index
    %32 = vector.load %arg6[%c30, %c0_30] : memref<50x128xf32, #tpu.memory_space<vmem>>, vector<5x128xf32>
    %c35 = arith.constant 35 : index
    %c0_31 = arith.constant 0 : index
    %33 = vector.load %arg6[%c35, %c0_31] : memref<50x128xf32, #tpu.memory_space<vmem>>, vector<5x128xf32>
    %34 = arith.maximumf %32, %33 : vector<5x128xf32>
    %c0_32 = arith.constant 0 : index
    %c15_33 = arith.constant 15 : index
    %c0_34 = arith.constant 0 : index
    %35 = vector.load %arg4[%c0_32, %c15_33, %c0_34] : memref<1x25x128xf32, #tpu.memory_space<vmem>>, vector<1x5x128xf32>
    %36 = vector.shape_cast %35 : vector<1x5x128xf32> to vector<5x128xf32>
    %37 = vector.shape_cast %34 : vector<5x128xf32> to vector<1x5x128xf32>
    tpu.vector_store %arg4[%c0_32, %c15_33, %c0_34], %37 {strides = array<i32>} : memref<1x25x128xf32, #tpu.memory_space<vmem>>, vector<1x5x128xf32>,
    %c40 = arith.constant 40 : index
    %c0_35 = arith.constant 0 : index
    %38 = vector.load %arg6[%c40, %c0_35] : memref<50x128xf32, #tpu.memory_space<vmem>>, vector<5x128xf32>
    %c45 = arith.constant 45 : index
    %c0_36 = arith.constant 0 : index
    %39 = vector.load %arg6[%c45, %c0_36] : memref<50x128xf32, #tpu.memory_space<vmem>>, vector<5x128xf32>
    %40 = arith.maximumf %38, %39 : vector<5x128xf32>
    %c0_37 = arith.constant 0 : index
    %c20_38 = arith.constant 20 : index
    %c0_39 = arith.constant 0 : index
    %41 = vector.load %arg4[%c0_37, %c20_38, %c0_39] : memref<1x25x128xf32, #tpu.memory_space<vmem>>, vector<1x5x128xf32>
    %42 = vector.shape_cast %41 : vector<1x5x128xf32> to vector<5x128xf32>
    %43 = vector.shape_cast %40 : vector<5x128xf32> to vector<1x5x128xf32>
    tpu.vector_store %arg4[%c0_37, %c20_38, %c0_39], %43 {strides = array<i32>} : memref<1x25x128xf32, #tpu.memory_space<vmem>>, vector<1x5x128xf32>,
    return
  }
  func.func @transform_0(%arg0: i32) -> (i32, i32, i32) {
    %c0_i32 = arith.constant 0 : i32
    %c0_i32_0 = arith.constant 0 : i32
    %c0_i32_1 = arith.constant 0 : i32
    return %arg0, %c0_i32, %c0_i32_0 : i32, i32, i32
  }
  func.func @transform_1(%arg0: i32) -> (i32, i32) {
    %c0_i32 = arith.constant 0 : i32
    %c0_i32_0 = arith.constant 0 : i32
    %c0_i32_1 = arith.constant 0 : i32
    return %c0_i32, %c0_i32_0 : i32, i32
  }
  func.func @transform_2(%arg0: i32) -> (i32, i32) {
    %c0_i32 = arith.constant 0 : i32
    %c0_i32_0 = arith.constant 0 : i32
    %c0_i32_1 = arith.constant 0 : i32
    return %c0_i32, %c0_i32_0 : i32, i32
  }
  func.func @transform_3(%arg0: i32) -> (i32, i32, i32) {
    %c0_i32 = arith.constant 0 : i32
    %c0_i32_0 = arith.constant 0 : i32
    %c0_i32_1 = arith.constant 0 : i32
    return %arg0, %c0_i32, %c0_i32_0 : i32, i32, i32
  }
}

</mosaic_0001>

<bundles_post_ra>
// kernel: cnn_forward.3
= control target key start
LH: loop header
LB: loop body
LE: loop exit
PB: predicated region body
PF: predicated region fallthrough
CT: control target
= control target key end

     0   :  { %s2168_s12 = smov 0   ;;  %s2579_s0 = inlined_call_operand.vmem [shape: bf16[2,784,128], index: 0, kind: input, shape index: {}]   ;;  %s2580_s1 = inlined_call_operand.vmem [shape: bf16[128,128], index: 1, kind: input, shape index: {}]   ;;  %s2581_s2 = inlined_call_operand.vmem [shape: f32[1,128], index: 2, kind: input, shape index: {}]   ;;  %s2582_s3 = inlined_call_operand.vmem [shape: f32[2,196,128], index: 3, kind: output, shape index: {}]  }
   0x1 LB: > { %s1716_s13 = sadd.s32 4294967295, %s2144_s12   ;;  %p1720_p0 = scmp.ge.s32.totalorder %s2144_s12, 1  ;;  %s2144_s12 = sphi %s2168_s12, %s13_s12  }
   0x2   : > { %p137_p1 = scmp.lt.s32.totalorder %s2144_s12, 3 }
   0x4   : > { %p138_p2 = pnand %p1720_p0, %p137_p1 }
   0x5   : > { %p161_p3 = scmp.lt.s32.totalorder (!%p138_p2), %s1716_s13, 1 }
   0x6   : > { %141 = sbr.rel (%p138_p2) target bundleno = 458 (0x1ca), region = 32 }
   0xb   : > { %v2080_v0 = vld [vmem:[%s2580_s1 + $0x38] sm:$0xff]   ;;  %v2146_v1 = vmov 0.0   ;;  %v2081_v2 = vld [vmem:[%s2580_s1 + $0x30] sm:$0xff]   ;;  %vm2147_vm0 = vmmov 0   ;;  %s2584_s13 = smov (!%p161_p3, %s1716_s13), 1  ;;  %v2082_v3 = vld [vmem:[%s2580_s1 + $0x28] sm:$0xff]  }
   0xc   : > { %1840 = vmatprep.subr.bf16.mxu0 %v2146_v1  ;;  %2052 = vmatprep.subr.bf16.mxu1 %v2146_v1  ;;  %s2068_s20 = smul.u32 392, %s2584_s13  ;;  %v2083_v4 = vld [vmem:[%s2580_s1 + $0x20] sm:$0xff]   ;;  %v2084_v5 = vld [vmem:[%s2580_s1 + $0x18] sm:$0xff]   ;;  %v2085_v6 = vld [vmem:[%s2580_s1 + $0x10] sm:$0xff]  }
   0xd   : > { %1841 = vmatpush3.bf16.msra.mxu0 %v2080_v0  ;;  %2060 = vmatpush3.bf16.msra.mxu1 %v2080_v0  ;;  %v2086_v7 = vld [vmem:[%s2580_s1 + $0x8] sm:$0xff]   ;;  %v2087_v8 = vld [vmem:[%s2580_s1] sm:$0xff]   ;;  %s2069_s9 = smul.u32 200, %s2584_s13 }
   0xe   : > { %1842 = vmatprep.subr.bf16.mxu0 %v2146_v1  ;;  %2053 = vmatprep.subr.bf16.mxu1 %v2146_v1  ;;  %s2201_s23 = scalar_lea.vmem %s2579_s0, %s2068_s20  ;;  %v2374_v58 = vld [vmem:[%s2581_s2] ss:$0 sm:$0xff] }
   0xf   : > { %1856 = vmatprep.mubr.msk.bf16.mxu0 %vm2147_vm0, %v2146_v1  ;;  %1956 = vmatprep.mubr.msk.bf16.mxu1 %vm2147_vm0, %v2146_v1  ;;  %v2088_v9 = vld [vmem:[%s2201_s23] sm:$0xff]   ;;  %v2089_v10 = vld [vmem:[%s2201_s23 + $0xc8] sm:$0xff]   ;;  %v2091_v12 = vld [vmem:[%s2201_s23 + $0xd0] sm:$0xff]   ;;  %s2412_s13 = scalar_lea.vmem %s2582_s3, %s2069_s9 }
  0x10   : > { %v2090_v11 = vld [vmem:[%s2201_s23 + $0x8] sm:$0xff]   ;;  %v2092_v13 = vld [vmem:[%s2201_s23 + $0x10] sm:$0xff]   ;;  %v2093_v14 = vld [vmem:[%s2201_s23 + $0xd8] sm:$0xff]  }
  0x11   : > { %1843 = vmatpush3.bf16.msra.mxu0 %v2081_v2  ;;  %2061 = vmatpush3.bf16.msra.mxu1 %v2081_v2  ;;  %v2094_v15 = vld [vmem:[%s2201_s23 + $0x18] sm:$0xff]   ;;  %v2095_v16 = vld [vmem:[%s2201_s23 + $0xe0] sm:$0xff]   ;;  %v2097_v18 = vld [vmem:[%s2201_s23 + $0xe8] sm:$0xff]  }
  0x12   : > { %1844 = vmatprep.subr.bf16.mxu0 %v2146_v1  ;;  %2054 = vmatprep.subr.bf16.mxu1 %v2146_v1  ;;  %v2096_v17 = vld [vmem:[%s2201_s23 + $0x20] sm:$0xff]   ;;  %v2098_v19 = vld [vmem:[%s2201_s23 + $0x28] sm:$0xff]   ;;  %v2099_v20 = vld [vmem:[%s2201_s23 + $0xf0] sm:$0xff]  }
  0x13   : > { %v2100_v21 = vld [vmem:[%s2201_s23 + $0x30] sm:$0xff]   ;;  %v2101_v22 = vld [vmem:[%s2201_s23 + $0xf8] sm:$0xff]   ;;  %v2103_v24 = vld [vmem:[%s2201_s23 + $0x100] sm:$0xff]  }
  0x14   : > { %v2102_v23 = vld [vmem:[%s2201_s23 + $0x38] sm:$0xff]   ;;  %v2104_v25 = vld [vmem:[%s2201_s23 + $0x40] sm:$0xff]   ;;  %v2105_v26 = vld [vmem:[%s2201_s23 + $0x108] sm:$0xff]  }
  0x15   : > { %1845 = vmatpush3.bf16.msra.mxu0 %v2082_v3  ;;  %2062 = vmatpush3.bf16.msra.mxu1 %v2082_v3  ;;  %v2106_v27 = vld [vmem:[%s2201_s23 + $0x48] sm:$0xff]   ;;  %v2107_v28 = vld [vmem:[%s2201_s23 + $0x110] sm:$0xff]   ;;  %v2109_v30 = vld [vmem:[%s2201_s23 + $0x118] sm:$0xff]  }
  0x16   : > { %1846 = vmatprep.subr.bf16.mxu0 %v2146_v1  ;;  %2055 = vmatprep.subr.bf16.mxu1 %v2146_v1  ;;  %v2108_v29 = vld [vmem:[%s2201_s23 + $0x50] sm:$0xff]   ;;  %v2110_v31 = vld [vmem:[%s2201_s23 + $0x58] sm:$0xff]   ;;  %v2111_v32 = vld [vmem:[%s2201_s23 + $0x120] sm:$0xff]  }
  0x17   : > { %v2112_v33 = vld [vmem:[%s2201_s23 + $0x60] sm:$0xff]   ;;  %v2113_v34 = vld [vmem:[%s2201_s23 + $0x128] sm:$0xff]   ;;  %v2115_v36 = vld [vmem:[%s2201_s23 + $0x130] sm:$0xff]  }
  0x18   : > { %v2114_v35 = vld [vmem:[%s2201_s23 + $0x68] sm:$0xff]   ;;  %v2116_v37 = vld [vmem:[%s2201_s23 + $0x70] sm:$0xff]   ;;  %v2117_v38 = vld [vmem:[%s2201_s23 + $0x138] sm:$0xff]  }
  0x19   : > { %1847 = vmatpush3.bf16.msra.mxu0 %v2083_v4  ;;  %2063 = vmatpush3.bf16.msra.mxu1 %v2083_v4  ;;  %v2118_v39 = vld [vmem:[%s2201_s23 + $0x78] sm:$0xff]   ;;  %v2119_v40 = vld [vmem:[%s2201_s23 + $0x140] sm:$0xff]   ;;  %v2121_v42 = vld [vmem:[%s2201_s23 + $0x148] sm:$0xff]  }
  0x1a   : > { %1848 = vmatprep.subr.bf16.mxu0 %v2146_v1  ;;  %2056 = vmatprep.subr.bf16.mxu1 %v2146_v1  ;;  %v2120_v41 = vld [vmem:[%s2201_s23 + $0x80] sm:$0xff]   ;;  %v2122_v43 = vld [vmem:[%s2201_s23 + $0x88] sm:$0xff]   ;;  %v2123_v44 = vld [vmem:[%s2201_s23 + $0x150] sm:$0xff]  }
  0x1b   : > { %v2124_v45 = vld [vmem:[%s2201_s23 + $0x90] sm:$0xff]   ;;  %v2125_v46 = vld [vmem:[%s2201_s23 + $0x158] sm:$0xff]   ;;  %v2127_v48 = vld [vmem:[%s2201_s23 + $0x160] sm:$0xff]  }
  0x1c   : > { %v2126_v47 = vld [vmem:[%s2201_s23 + $0x98] sm:$0xff]   ;;  %v2128_v49 = vld [vmem:[%s2201_s23 + $0xa0] sm:$0xff]   ;;  %v2129_v50 = vld [vmem:[%s2201_s23 + $0x168] sm:$0xff]  }
  0x1d   : > { %1849 = vmatpush3.bf16.msra.mxu0 %v2084_v5  ;;  %2064 = vmatpush3.bf16.msra.mxu1 %v2084_v5  ;;  %v2130_v51 = vld [vmem:[%s2201_s23 + $0xa8] sm:$0xff]   ;;  %v2131_v52 = vld [vmem:[%s2201_s23 + $0x170] sm:$0xff]   ;;  %v2133_v54 = vld [vmem:[%s2201_s23 + $0x178] sm:$0xff]  }
  0x1e   : > { %1850 = vmatprep.subr.bf16.mxu0 %v2146_v1  ;;  %2057 = vmatprep.subr.bf16.mxu1 %v2146_v1  ;;  %v2132_v53 = vld [vmem:[%s2201_s23 + $0xb0] sm:$0xff]   ;;  %v2134_v55 = vld [vmem:[%s2201_s23 + $0xb8] sm:$0xff]   ;;  %v2135_v56 = vld [vmem:[%s2201_s23 + $0x180] sm:$0xff]  }
  0x1f   : > { %v2136_v57 = vld [vmem:[%s2201_s23 + $0xc0] sm:$0xff]  }
  0x21   : > { %1851 = vmatpush3.bf16.msra.mxu0 %v2085_v6  ;;  %2065 = vmatpush3.bf16.msra.mxu1 %v2085_v6 }
  0x22   : > { %1852 = vmatprep.subr.bf16.mxu0 %v2146_v1  ;;  %2058 = vmatprep.subr.bf16.mxu1 %v2146_v1 }
  0x25   : > { %1853 = vmatpush3.bf16.msra.mxu0 %v2086_v7  ;;  %2066 = vmatpush3.bf16.msra.mxu1 %v2086_v7 }
  0x26   : > { %1854 = vmatprep.subr.bf16.mxu0 %v2146_v1  ;;  %2059 = vmatprep.subr.bf16.mxu1 %v2146_v1 }
  0x29   : > { %1855 = vmatpush3.bf16.msra.mxu0 %v2087_v8  ;;  %2067 = vmatpush3.bf16.msra.mxu1 %v2087_v8 }
  0x2c   : > { %1857 = vmatmul.mubr.bf16.vlgmr.msra.gmra.mxu0 %v2088_v9  ;;  %1957 = vmatmul.mubr.bf16.vlgmr.msra.gmra.mxu1 %v2089_v10 }
  0x2d   : > { %1860 = vmatprep.mubr.msk.bf16.mxu0 %vm2147_vm0, %v2146_v1  ;;  %1960 = vmatprep.mubr.msk.bf16.mxu1 %vm2147_vm0, %v2146_v1 }
  0x34   : > { %1861 = vmatmul.mubr.bf16.gmra.mxu0 %v2090_v11  ;;  %1961 = vmatmul.mubr.bf16.gmra.mxu1 %v2091_v12 }
  0x35   : > { %1864 = vmatprep.mubr.msk.bf16.mxu0 %vm2147_vm0, %v2146_v1  ;;  %1964 = vmatprep.mubr.msk.bf16.mxu1 %vm2147_vm0, %v2146_v1 }
  0x3c   : > { %1865 = vmatmul.mubr.bf16.gmra.mxu0 %v2092_v13  ;;  %1965 = vmatmul.mubr.bf16.gmra.mxu1 %v2093_v14 }
  0x3d   : > { %1868 = vmatprep.mubr.msk.bf16.mxu0 %vm2147_vm0, %v2146_v1  ;;  %1968 = vmatprep.mubr.msk.bf16.mxu1 %vm2147_vm0, %v2146_v1 }
  0x44   : > { %1869 = vmatmul.mubr.bf16.gmra.mxu0 %v2094_v15  ;;  %1969 = vmatmul.mubr.bf16.gmra.mxu1 %v2095_v16 }
  0x45   : > { %1872 = vmatprep.mubr.msk.bf16.mxu0 %vm2147_vm0, %v2146_v1  ;;  %1972 = vmatprep.mubr.msk.bf16.mxu1 %vm2147_vm0, %v2146_v1 }
  0x4c   : > { %1873 = vmatmul.mubr.bf16.gmra.mxu0 %v2096_v17  ;;  %1973 = vmatmul.mubr.bf16.gmra.mxu1 %v2097_v18 }
  0x4d   : > { %1876 = vmatprep.mubr.msk.bf16.mxu0 %vm2147_vm0, %v2146_v1  ;;  %1976 = vmatprep.mubr.msk.bf16.mxu1 %vm2147_vm0, %v2146_v1 }
  0x54   : > { %1877 = vmatmul.mubr.bf16.gmra.mxu0 %v2098_v19  ;;  %1977 = vmatmul.mubr.bf16.gmra.mxu1 %v2099_v20 }
  0x55   : > { %1880 = vmatprep.mubr.msk.bf16.mxu0 %vm2147_vm0, %v2146_v1  ;;  %1980 = vmatprep.mubr.msk.bf16.mxu1 %vm2147_vm0, %v2146_v1 }
  0x5c   : > { %1881 = vmatmul.mubr.bf16.gmra.mxu0 %v2100_v21  ;;  %1981 = vmatmul.mubr.bf16.gmra.mxu1 %v2101_v22 }
  0x5d   : > { %1884 = vmatprep.mubr.msk.bf16.mxu0 %vm2147_vm0, %v2146_v1  ;;  %1984 = vmatprep.mubr.msk.bf16.mxu1 %vm2147_vm0, %v2146_v1 }
  0x64   : > { %1885 = vmatmul.mubr.bf16.gmra.mxu0 %v2102_v23  ;;  %1985 = vmatmul.mubr.bf16.gmra.mxu1 %v2103_v24 }
  0x65   : > { %1888 = vmatprep.mubr.msk.bf16.mxu0 %vm2147_vm0, %v2146_v1  ;;  %1988 = vmatprep.mubr.msk.bf16.mxu1 %vm2147_vm0, %v2146_v1 }
  0x6c   : > { %1889 = vmatmul.mubr.bf16.gmra.mxu0 %v2104_v25  ;;  %1989 = vmatmul.mubr.bf16.gmra.mxu1 %v2105_v26 }
  0x6d   : > { %1892 = vmatprep.mubr.msk.bf16.mxu0 %vm2147_vm0, %v2146_v1  ;;  %1992 = vmatprep.mubr.msk.bf16.mxu1 %vm2147_vm0, %v2146_v1 }
  0x74   : > { %1893 = vmatmul.mubr.bf16.gmra.mxu0 %v2106_v27  ;;  %1993 = vmatmul.mubr.bf16.gmra.mxu1 %v2107_v28 }
  0x75   : > { %1896 = vmatprep.mubr.msk.bf16.mxu0 %vm2147_vm0, %v2146_v1  ;;  %1996 = vmatprep.mubr.msk.bf16.mxu1 %vm2147_vm0, %v2146_v1 }
  0x7c   : > { %1897 = vmatmul.mubr.bf16.gmra.mxu0 %v2108_v29  ;;  %1997 = vmatmul.mubr.bf16.gmra.mxu1 %v2109_v30 }
  0x7d   : > { %1900 = vmatprep.mubr.msk.bf16.mxu0 %vm2147_vm0, %v2146_v1  ;;  %2000 = vmatprep.mubr.msk.bf16.mxu1 %vm2147_vm0, %v2146_v1 }
  0x84   : > { %1901 = vmatmul.mubr.bf16.gmra.mxu0 %v2110_v31  ;;  %2001 = vmatmul.mubr.bf16.gmra.mxu1 %v2111_v32 }
  0x85   : > { %1904 = vmatprep.mubr.msk.bf16.mxu0 %vm2147_vm0, %v2146_v1  ;;  %2004 = vmatprep.mubr.msk.bf16.mxu1 %vm2147_vm0, %v2146_v1 }
  0x8c   : > { %1905 = vmatmul.mubr.bf16.gmra.mxu0 %v2112_v33  ;;  %2005 = vmatmul.mubr.bf16.gmra.mxu1 %v2113_v34 }
  0x8d   : > { %1908 = vmatprep.mubr.msk.bf16.mxu0 %vm2147_vm0, %v2146_v1  ;;  %2008 = vmatprep.mubr.msk.bf16.mxu1 %vm2147_vm0, %v2146_v1 }
  0x94   : > { %1909 = vmatmul.mubr.bf16.gmra.mxu0 %v2114_v35  ;;  %2009 = vmatmul.mubr.bf16.gmra.mxu1 %v2115_v36 }
  0x95   : > { %1912 = vmatprep.mubr.msk.bf16.mxu0 %vm2147_vm0, %v2146_v1  ;;  %2012 = vmatprep.mubr.msk.bf16.mxu1 %vm2147_vm0, %v2146_v1 }
  0x9c   : > { %1913 = vmatmul.mubr.bf16.gmra.mxu0 %v2116_v37  ;;  %2013 = vmatmul.mubr.bf16.gmra.mxu1 %v2117_v38 }
  0x9d   : > { %1916 = vmatprep.mubr.msk.bf16.mxu0 %vm2147_vm0, %v2146_v1  ;;  %2016 = vmatprep.mubr.msk.bf16.mxu1 %vm2147_vm0, %v2146_v1 }
  0xa4   : > { %1917 = vmatmul.mubr.bf16.gmra.mxu0 %v2118_v39  ;;  %2017 = vmatmul.mubr.bf16.gmra.mxu1 %v2119_v40 }
  0xa5   : > { %1920 = vmatprep.mubr.msk.bf16.mxu0 %vm2147_vm0, %v2146_v1  ;;  %2020 = vmatprep.mubr.msk.bf16.mxu1 %vm2147_vm0, %v2146_v1 }
  0xac   : > { %1921 = vmatmul.mubr.bf16.gmra.mxu0 %v2120_v41  ;;  %2021 = vmatmul.mubr.bf16.gmra.mxu1 %v2121_v42 }
  0xad   : > { %1924 = vmatprep.mubr.msk.bf16.mxu0 %vm2147_vm0, %v2146_v1  ;;  %2024 = vmatprep.mubr.msk.bf16.mxu1 %vm2147_vm0, %v2146_v1 }
  0xb4   : > { %1925 = vmatmul.mubr.bf16.gmra.mxu0 %v2122_v43  ;;  %2025 = vmatmul.mubr.bf16.gmra.mxu1 %v2123_v44 }
  0xb5   : > { %1928 = vmatprep.mubr.msk.bf16.mxu0 %vm2147_vm0, %v2146_v1  ;;  %2028 = vmatprep.mubr.msk.bf16.mxu1 %vm2147_vm0, %v2146_v1 }
  0xbc   : > { %1929 = vmatmul.mubr.bf16.gmra.mxu0 %v2124_v45  ;;  %2029 = vmatmul.mubr.bf16.gmra.mxu1 %v2125_v46 }
  0xbd   : > { %1932 = vmatprep.mubr.msk.bf16.mxu0 %vm2147_vm0, %v2146_v1  ;;  %2032 = vmatprep.mubr.msk.bf16.mxu1 %vm2147_vm0, %v2146_v1 }
  0xc4   : > { %1933 = vmatmul.mubr.bf16.gmra.mxu0 %v2126_v47  ;;  %2033 = vmatmul.mubr.bf16.gmra.mxu1 %v2127_v48 }
  0xc5   : > { %1936 = vmatprep.mubr.msk.bf16.mxu0 %vm2147_vm0, %v2146_v1  ;;  %2036 = vmatprep.mubr.msk.bf16.mxu1 %vm2147_vm0, %v2146_v1 }
  0xcc   : > { %1937 = vmatmul.mubr.bf16.gmra.mxu0 %v2128_v49  ;;  %2037 = vmatmul.mubr.bf16.gmra.mxu1 %v2129_v50 }
  0xcd   : > { %1940 = vmatprep.mubr.msk.bf16.mxu0 %vm2147_vm0, %v2146_v1  ;;  %2040 = vmatprep.mubr.msk.bf16.mxu1 %vm2147_vm0, %v2146_v1 }
  0xd4   : > { %1941 = vmatmul.mubr.bf16.gmra.mxu0 %v2130_v51  ;;  %2041 = vmatmul.mubr.bf16.gmra.mxu1 %v2131_v52 }
  0xd5   : > { %1944 = vmatprep.mubr.msk.bf16.mxu0 %vm2147_vm0, %v2146_v1  ;;  %2044 = vmatprep.mubr.msk.bf16.mxu1 %vm2147_vm0, %v2146_v1 }
  0xdc   : > { %1945 = vmatmul.mubr.bf16.gmra.mxu0 %v2132_v53  ;;  %2045 = vmatmul.mubr.bf16.gmra.mxu1 %v2133_v54 }
  0xdd   : > { %1948 = vmatprep.mubr.msk.bf16.mxu0 %vm2147_vm0, %v2146_v1  ;;  %2048 = vmatprep.mubr.msk.bf16.mxu1 %vm2147_vm0, %v2146_v1 }
  0xe4   : > { %1949 = vmatmul.mubr.bf16.gmra.mxu0 %v2134_v55  ;;  %2049 = vmatmul.mubr.bf16.gmra.mxu1 %v2135_v56 }
  0xe5   : > { %1952 = vmatprep.mubr.msk.bf16.mxu0 %vm2147_vm0, %v2146_v1 }
  0xec   : > { %v669_v59 = vpop.f32.mrf.mxu0  ;;  %1953 = vmatmul.mubr.bf16.gmra.mxu0 %v2136_v57  ;;  %v869_v60 = vpop.f32.mrf.mxu1 }
  0xed   : > { %v670_v61 = vadd.f32 %v2374_v58, %v669_v59  ;;  %v870_v62 = vadd.f32 %v2374_v58, %v869_v60 }
  0xee   : > { %v1858_v63 = vpop.f32.mrf.mxu0  ;;  %v1958_v0 = vpop.f32.mrf.mxu1 }
  0xef   : > { %v1060_v2 = vmax.f32 %v670_v61, 0.0  ;;  %v1110_v3 = vmax.f32 %v870_v62, 0.0 }
  0xf0   : > { %v672_v4 = vpop.f32.mrf.mxu0  ;;  %v872_v5 = vpop.f32.mrf.mxu1 }
  0xf1   : > { %1158 = vst [vmem:[#allocation2] sm:$0xff] %v1060_v2  ;;  %1208 = vst [vmem:[#allocation2 + $0x190] sm:$0xff] %v1110_v3  ;;  %v673_v1 = vadd.f32 %v2374_v58, %v672_v4  ;;  %v873_v6 = vadd.f32 %v2374_v58, %v872_v5 }
  0xf2   : > { %v1859_v7 = vpop.f32.mrf.mxu0  ;;  %v1959_v8 = vpop.f32.mrf.mxu1 }
  0xf3   : > { %v1061_v9 = vmax.f32 %v673_v1, 0.0  ;;  %v1111_v10 = vmax.f32 %v873_v6, 0.0 }
  0xf4   : > { %v677_v11 = vpop.f32.mrf.mxu0  ;;  %v877_v12 = vpop.f32.mrf.mxu1 }
  0xf5   : > { %1159 = vst [vmem:[#allocation2 + $0x8] sm:$0xff] %v1061_v9  ;;  %1209 = vst [vmem:[#allocation2 + $0x198] sm:$0xff] %v1111_v10  ;;  %v678_v13 = vadd.f32 %v2374_v58, %v677_v11  ;;  %v878_v14 = vadd.f32 %v2374_v58, %v877_v12 }
  0xf6   : > { %v1862_v15 = vpop.f32.mrf.mxu0  ;;  %v1962_v16 = vpop.f32.mrf.mxu1 }
  0xf7   : > { %v1062_v17 = vmax.f32 %v678_v13, 0.0  ;;  %v1112_v18 = vmax.f32 %v878_v14, 0.0 }
  0xf8   : > { %v680_v19 = vpop.f32.mrf.mxu0  ;;  %v880_v20 = vpop.f32.mrf.mxu1 }
  0xf9   : > { %1160 = vst [vmem:[#allocation2 + $0x10] sm:$0xff] %v1062_v17  ;;  %1210 = vst [vmem:[#allocation2 + $0x1a0] sm:$0xff] %v1112_v18  ;;  %v681_v21 = vadd.f32 %v2374_v58, %v680_v19  ;;  %v881_v22 = vadd.f32 %v2374_v58, %v880_v20 }
  0xfa   : > { %v1863_v23 = vpop.f32.mrf.mxu0  ;;  %v1963_v24 = vpop.f32.mrf.mxu1 }
  0xfb   : > { %v1063_v25 = vmax.f32 %v681_v21, 0.0  ;;  %v1113_v26 = vmax.f32 %v881_v22, 0.0 }
  0xfc   : > { %v2384_v27 = vld [vmem:[#allocation2] ss:$2 sm:$0xff]  ;;  %v2386_v28 = vld [vmem:[#allocation2 + $0x1] ss:$2 sm:$0xff]  ;;  %v1306_v29 = vld [vmem:[#allocation2 + $0x190] ss:$2 sm:$0xff]  ;;  %v685_v30 = vpop.f32.mrf.mxu0  ;;  %v885_v31 = vpop.f32.mrf.mxu1 }
  0xfd   : > { %v1451_v32 = vmax.f32 %v2384_v27, %v2386_v28  ;;  %v1404_v33 = vld [vmem:[#allocation2 + $0x191] ss:$2 sm:$0xff]  ;;  %1161 = vst [vmem:[#allocation2 + $0x18] sm:$0xff] %v1063_v25  ;;  %1211 = vst [vmem:[#allocation2 + $0x1a8] sm:$0xff] %v1113_v26  ;;  %v686_v34 = vadd.f32 %v2374_v58, %v685_v30  ;;  %v886_v35 = vadd.f32 %v2374_v58, %v885_v31 }
  0xfe   : > { %v1476_v36 = vmax.f32 %v1306_v29, %v1404_v33  ;;  %v1866_v37 = vpop.f32.mrf.mxu0  ;;  %v1966_v38 = vpop.f32.mrf.mxu1 }
  0xff   : > { %v1064_v39 = vmax.f32 %v686_v34, 0.0  ;;  %v1114_v40 = vmax.f32 %v886_v35, 0.0 }
 0x100   : > { %1525 = vst [vmem:[#allocation3 + $0xc8] sm:$0xff] %v1476_v36  ;;  %v688_v41 = vpop.f32.mrf.mxu0  ;;  %v888_v42 = vpop.f32.mrf.mxu1 }
 0x101   : > { %1162 = vst [vmem:[#allocation2 + $0x20] sm:$0xff] %v1064_v39  ;;  %1212 = vst [vmem:[#allocation2 + $0x1b0] sm:$0xff] %v1114_v40  ;;  %v689_v43 = vadd.f32 %v2374_v58, %v688_v41  ;;  %v889_v44 = vadd.f32 %v2374_v58, %v888_v42 }
 0x102   : > { %v1867_v45 = vpop.f32.mrf.mxu0  ;;  %v1967_v46 = vpop.f32.mrf.mxu1 }
 0x103   : > { %v1065_v47 = vmax.f32 %v689_v43, 0.0  ;;  %v1115_v48 = vmax.f32 %v889_v44, 0.0 }
 0x104   : > { %v1258_v49 = vld [vmem:[#allocation2 + $0x10] ss:$2 sm:$0xff]  ;;  %v1356_v50 = vld [vmem:[#allocation2 + $0x11] ss:$2 sm:$0xff]  ;;  %v1308_v51 = vld [vmem:[#allocation2 + $0x1a0] ss:$2 sm:$0xff]  ;;  %v693_v52 = vpop.f32.mrf.mxu0  ;;  %v893_v53 = vpop.f32.mrf.mxu1 }
 0x105   : > { %v1452_v54 = vmax.f32 %v1258_v49, %v1356_v50  ;;  %v1406_v55 = vld [vmem:[#allocation2 + $0x1a1] ss:$2 sm:$0xff]  ;;  %1163 = vst [vmem:[#allocation2 + $0x28] sm:$0xff] %v1065_v47  ;;  %1213 = vst [vmem:[#allocation2 + $0x1b8] sm:$0xff] %v1115_v48  ;;  %v694_v56 = vadd.f32 %v2374_v58, %v693_v52  ;;  %v894_v57 = vadd.f32 %v2374_v58, %v893_v53 }
 0x106   : > { %v1477_v59 = vmax.f32 %v1308_v51, %v1406_v55  ;;  %v1870_v60 = vpop.f32.mrf.mxu0  ;;  %v1970_v61 = vpop.f32.mrf.mxu1 }
 0x107   : > { %1501 = vst [vmem:[#allocation3 + $0x8] sm:$0xff] %v1452_v54  ;;  %v1066_v62 = vmax.f32 %v694_v56, 0.0  ;;  %v1116_v63 = vmax.f32 %v894_v57, 0.0 }
 0x108   : > { %1526 = vst [vmem:[#allocation3 + $0xd0] sm:$0xff] %v1477_v59  ;;  %v696_v0 = vpop.f32.mrf.mxu0  ;;  %v896_v2 = vpop.f32.mrf.mxu1 }
 0x109   : > { %1164 = vst [vmem:[#allocation2 + $0x30] sm:$0xff] %v1066_v62  ;;  %1214 = vst [vmem:[#allocation2 + $0x1c0] sm:$0xff] %v1116_v63  ;;  %v697_v3 = vadd.f32 %v2374_v58, %v696_v0  ;;  %v897_v4 = vadd.f32 %v2374_v58, %v896_v2 }
 0x10a   : > { %v1871_v5 = vpop.f32.mrf.mxu0  ;;  %v1971_v1 = vpop.f32.mrf.mxu1 }
 0x10b   : > { %v1067_v6 = vmax.f32 %v697_v3, 0.0  ;;  %v1117_v7 = vmax.f32 %v897_v4, 0.0 }
 0x10c   : > { %v1260_v8 = vld [vmem:[#allocation2 + $0x20] ss:$2 sm:$0xff]  ;;  %v1358_v9 = vld [vmem:[#allocation2 + $0x21] ss:$2 sm:$0xff]  ;;  %v1310_v10 = vld [vmem:[#allocation2 + $0x1b0] ss:$2 sm:$0xff]  ;;  %v701_v11 = vpop.f32.mrf.mxu0  ;;  %v901_v12 = vpop.f32.mrf.mxu1 }
 0x10d   : > { %v1453_v13 = vmax.f32 %v1260_v8, %v1358_v9  ;;  %v1408_v14 = vld [vmem:[#allocation2 + $0x1b1] ss:$2 sm:$0xff]  ;;  %1165 = vst [vmem:[#allocation2 + $0x38] sm:$0xff] %v1067_v6  ;;  %1215 = vst [vmem:[#allocation2 + $0x1c8] sm:$0xff] %v1117_v7  ;;  %v702_v15 = vadd.f32 %v2374_v58, %v701_v11  ;;  %v902_v16 = vadd.f32 %v2374_v58, %v901_v12 }
 0x10e   : > { %v1478_v17 = vmax.f32 %v1310_v10, %v1408_v14  ;;  %v1874_v18 = vpop.f32.mrf.mxu0  ;;  %v1974_v19 = vpop.f32.mrf.mxu1  ;;  %v1550_v4 = vld [vmem:[#allocation3 + $0x8] sm:$0x3f] }
 0x10f   : > { %1502 = vst [vmem:[#allocation3 + $0x10] sm:$0xff] %v1453_v13  ;;  %v1068_v20 = vmax.f32 %v702_v15, 0.0  ;;  %v1118_v21 = vmax.f32 %v902_v16, 0.0  ;;  %v1606_v46 = vld [vmem:[#allocation3 + $0xcc] sm:$0x3f] }
 0x110   : > { %1527 = vst [vmem:[#allocation3 + $0xd8] sm:$0xff] %v1478_v17  ;;  %v704_v22 = vpop.f32.mrf.mxu0  ;;  %v904_v23 = vpop.f32.mrf.mxu1 }
 0x111   : > { %1166 = vst [vmem:[#allocation2 + $0x40] sm:$0xff] %v1068_v20  ;;  %1216 = vst [vmem:[#allocation2 + $0x1d0] sm:$0xff] %v1118_v21  ;;  %v705_v24 = vadd.f32 %v2374_v58, %v704_v22  ;;  %v905_v25 = vadd.f32 %v2374_v58, %v904_v23 }
 0x112   : > { %v1875_v26 = vpop.f32.mrf.mxu0  ;;  %v1975_v29 = vpop.f32.mrf.mxu1 }
 0x113   : > { %v1069_v30 = vmax.f32 %v705_v24, 0.0  ;;  %v1119_v31 = vmax.f32 %v905_v25, 0.0 }
 0x114   : > { %v1262_v33 = vld [vmem:[#allocation2 + $0x30] ss:$2 sm:$0xff]  ;;  %v1360_v34 = vld [vmem:[#allocation2 + $0x31] ss:$2 sm:$0xff]  ;;  %v2403_v35 = vld [vmem:[#allocation2 + $0x1c0] ss:$2 sm:$0xff]  ;;  %v709_v36 = vpop.f32.mrf.mxu0  ;;  %v909_v37 = vpop.f32.mrf.mxu1 }
 0x115   : > { %v1454_v38 = vmax.f32 %v1262_v33, %v1360_v34  ;;  %v2405_v39 = vld [vmem:[#allocation2 + $0x1c1] ss:$2 sm:$0xff]  ;;  %1167 = vst [vmem:[#allocation2 + $0x48] sm:$0xff] %v1069_v30  ;;  %1217 = vst [vmem:[#allocation2 + $0x1d8] sm:$0xff] %v1119_v31  ;;  %v710_v40 = vadd.f32 %v2374_v58, %v709_v36  ;;  %v910_v41 = vadd.f32 %v2374_v58, %v909_v37 }
 0x116   : > { %v1551_v42 = vld [vmem:[#allocation3 + $0xe] sm:$0xff]  ;;  %v1479_v43 = vmax.f32 %v2403_v35, %v2405_v39  ;;  %v1878_v44 = vpop.f32.mrf.mxu0  ;;  %v1978_v45 = vpop.f32.mrf.mxu1 }
 0x117   : > { %v1553_v47 = vmax.f32 %v1451_v32, %v1551_v42  ;;  %v1608_v48 = vld [vmem:[#allocation3 + $0xda] sm:$0x3f]  ;;  %1503 = vst [vmem:[#allocation3 + $0x18] sm:$0xff] %v1454_v38  ;;  %v1070_v49 = vmax.f32 %v710_v40, 0.0  ;;  %v1120_v50 = vmax.f32 %v910_v41, 0.0 }
 0x118   : > { %v1610_v51 = vmax.f32 %v1606_v46, %v1608_v48  ;;  %v712_v52 = vpop.f32.mrf.mxu0  ;;  %v912_v53 = vpop.f32.mrf.mxu1 }
 0x119   : > { %1555 = vst [vmem:[%s2412_s13] sm:$0xff] %v1553_v47  ;;  %1168 = vst [vmem:[#allocation2 + $0x50] sm:$0xff] %v1070_v49  ;;  %v713_v54 = vadd.f32 %v2374_v58, %v712_v52  ;;  %v913_v55 = vadd.f32 %v2374_v58, %v912_v53 }
 0x11a   : > { %1218 = vst [vmem:[#allocation2 + $0x1e0] sm:$0xff] %v1120_v50  ;;  %1612 = vst [vmem:[%s2412_s13 + $0x6a] sm:$0x3f] %v1610_v51  ;;  %v1879_v56 = vpop.f32.mrf.mxu0  ;;  %v1979_v57 = vpop.f32.mrf.mxu1 }
 0x11b   : > { %v1071_v59 = vmax.f32 %v713_v54, 0.0  ;;  %v1121_v27 = vmax.f32 %v913_v55, 0.0 }
 0x11c   : > { %v1264_v28 = vld [vmem:[#allocation2 + $0x40] ss:$2 sm:$0xff]  ;;  %v1362_v32 = vld [vmem:[#allocation2 + $0x41] ss:$2 sm:$0xff]  ;;  %v1314_v60 = vld [vmem:[#allocation2 + $0x1d0] ss:$2 sm:$0xff]  ;;  %v717_v61 = vpop.f32.mrf.mxu0  ;;  %v917_v62 = vpop.f32.mrf.mxu1 }
 0x11d   : > { %v1455_v63 = vmax.f32 %v1264_v28, %v1362_v32  ;;  %v1412_v0 = vld [vmem:[#allocation2 + $0x1d1] ss:$2 sm:$0xff]  ;;  %1169 = vst [vmem:[#allocation2 + $0x58] sm:$0xff] %v1071_v59  ;;  %1219 = vst [vmem:[#allocation2 + $0x1e8] sm:$0xff] %v1121_v27  ;;  %v718_v2 = vadd.f32 %v2374_v58, %v717_v61  ;;  %v918_v3 = vadd.f32 %v2374_v58, %v917_v62 }
 0x11e   : > { %v1552_v5 = vld [vmem:[#allocation3 + $0x16] sm:$0x3f]  ;;  %v1480_v1 = vmax.f32 %v1314_v60, %v1412_v0  ;;  %v1882_v6 = vpop.f32.mrf.mxu0  ;;  %v1982_v7 = vpop.f32.mrf.mxu1 }
 0x11f   : > { %v1554_v8 = vmax.f32 %v1550_v4, %v1552_v5  ;;  %1504 = vst [vmem:[#allocation3 + $0x20] sm:$0xff] %v1455_v63  ;;  %v1072_v9 = vmax.f32 %v718_v2, 0.0  ;;  %v1122_v10 = vmax.f32 %v918_v3, 0.0 }
 0x120   : > { %1529 = vst [vmem:[#allocation3 + $0xe8] sm:$0xff] %v1480_v1  ;;  %v720_v11 = vpop.f32.mrf.mxu0  ;;  %v920_v12 = vpop.f32.mrf.mxu1 }
 0x121   : > { %1556 = vst [vmem:[%s2412_s13 + $0x8] sm:$0x3f] %v1554_v8  ;;  %1170 = vst [vmem:[#allocation2 + $0x60] sm:$0xff] %v1072_v9  ;;  %v721_v13 = vadd.f32 %v2374_v58, %v720_v11  ;;  %v921_v14 = vadd.f32 %v2374_v58, %v920_v12 }
 0x122   : > { %1220 = vst [vmem:[#allocation2 + $0x1f0] sm:$0xff] %v1122_v10  ;;  %v1883_v15 = vpop.f32.mrf.mxu0  ;;  %v1983_v16 = vpop.f32.mrf.mxu1 }
 0x123   : > { %v1073_v17 = vmax.f32 %v721_v13, 0.0  ;;  %v1123_v18 = vmax.f32 %v921_v14, 0.0 }
 0x124   : > { %v1266_v19 = vld [vmem:[#allocation2 + $0x50] ss:$2 sm:$0xff]  ;;  %v1364_v20 = vld [vmem:[#allocation2 + $0x51] ss:$2 sm:$0xff]  ;;  %v1316_v21 = vld [vmem:[#allocation2 + $0x1e0] ss:$2 sm:$0xff]  ;;  %v725_v22 = vpop.f32.mrf.mxu0  ;;  %v925_v23 = vpop.f32.mrf.mxu1 }
 0x125   : > { %v1456_v24 = vmax.f32 %v1266_v19, %v1364_v20  ;;  %v1414_v25 = vld [vmem:[#allocation2 + $0x1e1] ss:$2 sm:$0xff]  ;;  %1171 = vst [vmem:[#allocation2 + $0x68] sm:$0xff] %v1073_v17  ;;  %1221 = vst [vmem:[#allocation2 + $0x1f8] sm:$0xff] %v1123_v18  ;;  %v726_v26 = vadd.f32 %v2374_v58, %v725_v22  ;;  %v926_v29 = vadd.f32 %v2374_v58, %v925_v23 }
 0x126   : > { %v1481_v30 = vmax.f32 %v1316_v21, %v1414_v25  ;;  %v1886_v31 = vpop.f32.mrf.mxu0  ;;  %v1986_v33 = vpop.f32.mrf.mxu1  ;;  %v1557_v7 = vld [vmem:[#allocation3 + $0x1c] sm:$0xff] }
 0x127   : > { %1505 = vst [vmem:[#allocation3 + $0x28] sm:$0xff] %v1456_v24  ;;  %v1074_v34 = vmax.f32 %v726_v26, 0.0  ;;  %v1124_v36 = vmax.f32 %v926_v29, 0.0  ;;  %v1614_v18 = vld [vmem:[#allocation3 + $0xe8] sm:$0x3f] }
 0x128   : > { %1530 = vst [vmem:[#allocation3 + $0xf0] sm:$0xff] %v1481_v30  ;;  %v728_v37 = vpop.f32.mrf.mxu0  ;;  %v928_v38 = vpop.f32.mrf.mxu1 }
 0x129   : > { %1172 = vst [vmem:[#allocation2 + $0x70] sm:$0xff] %v1074_v34  ;;  %1222 = vst [vmem:[#allocation2 + $0x200] sm:$0xff] %v1124_v36  ;;  %v729_v40 = vadd.f32 %v2374_v58, %v728_v37  ;;  %v929_v41 = vadd.f32 %v2374_v58, %v928_v38 }
 0x12a   : > { %v1887_v42 = vpop.f32.mrf.mxu0  ;;  %v1987_v44 = vpop.f32.mrf.mxu1 }
 0x12b   : > { %v1075_v45 = vmax.f32 %v729_v40, 0.0  ;;  %v1125_v46 = vmax.f32 %v929_v41, 0.0 }
 0x12c   : > { %v1268_v47 = vld [vmem:[#allocation2 + $0x60] ss:$2 sm:$0xff]  ;;  %v1366_v48 = vld [vmem:[#allocation2 + $0x61] ss:$2 sm:$0xff]  ;;  %v1318_v49 = vld [vmem:[#allocation2 + $0x1f0] ss:$2 sm:$0xff]  ;;  %v733_v50 = vpop.f32.mrf.mxu0  ;;  %v933_v51 = vpop.f32.mrf.mxu1 }
 0x12d   : > { %v1457_v52 = vmax.f32 %v1268_v47, %v1366_v48  ;;  %v1416_v53 = vld [vmem:[#allocation2 + $0x1f1] ss:$2 sm:$0xff]  ;;  %1173 = vst [vmem:[#allocation2 + $0x78] sm:$0xff] %v1075_v45  ;;  %1223 = vst [vmem:[#allocation2 + $0x208] sm:$0xff] %v1125_v46  ;;  %v734_v54 = vadd.f32 %v2374_v58, %v733_v50  ;;  %v934_v55 = vadd.f32 %v2374_v58, %v933_v51 }
 0x12e   : > { %v1482_v56 = vmax.f32 %v1318_v49, %v1416_v53  ;;  %v1890_v57 = vpop.f32.mrf.mxu0  ;;  %v1990_v59 = vpop.f32.mrf.mxu1  ;;  %v1558_v12 = vld [vmem:[#allocation3 + $0x24] sm:$0x3f] }
 0x12f   : > { %v1615_v27 = vld [vmem:[#allocation3 + $0xee] sm:$0xff]  ;;  %1506 = vst [vmem:[#allocation3 + $0x30] sm:$0xff] %v1457_v52  ;;  %v1076_v28 = vmax.f32 %v734_v54, 0.0  ;;  %v1126_v32 = vmax.f32 %v934_v55, 0.0 }
 0x130   : > { %v1617_v60 = vmax.f32 %v1479_v43, %v1615_v27  ;;  %1531 = vst [vmem:[#allocation3 + $0xf8] sm:$0xff] %v1482_v56  ;;  %v736_v61 = vpop.f32.mrf.mxu0  ;;  %v936_v62 = vpop.f32.mrf.mxu1 }
 0x131   : > { %1174 = vst [vmem:[#allocation2 + $0x80] sm:$0xff] %v1076_v28  ;;  %1224 = vst [vmem:[#allocation2 + $0x210] sm:$0xff] %v1126_v32  ;;  %v737_v63 = vadd.f32 %v2374_v58, %v736_v61  ;;  %v937_v0 = vadd.f32 %v2374_v58, %v936_v62 }
 0x132   : > { %1619 = vst [vmem:[%s2412_s13 + $0x70] sm:$0xff] %v1617_v60  ;;  %v1891_v2 = vpop.f32.mrf.mxu0  ;;  %v1991_v3 = vpop.f32.mrf.mxu1 }
 0x133   : > { %v1077_v4 = vmax.f32 %v737_v63, 0.0  ;;  %v1127_v5 = vmax.f32 %v937_v0, 0.0 }
 0x134   : > { %v2440_v1 = vld [vmem:[#allocation2 + $0x70] ss:$2 sm:$0xff]  ;;  %v2442_v6 = vld [vmem:[#allocation2 + $0x71] ss:$2 sm:$0xff]  ;;  %v1320_v35 = vld [vmem:[#allocation2 + $0x200] ss:$2 sm:$0xff]  ;;  %v741_v39 = vpop.f32.mrf.mxu0  ;;  %v941_v43 = vpop.f32.mrf.mxu1 }
 0x135   : > { %v1458_v8 = vmax.f32 %v2440_v1, %v2442_v6  ;;  %v1418_v9 = vld [vmem:[#allocation2 + $0x201] ss:$2 sm:$0xff]  ;;  %1175 = vst [vmem:[#allocation2 + $0x88] sm:$0xff] %v1077_v4  ;;  %1225 = vst [vmem:[#allocation2 + $0x218] sm:$0xff] %v1127_v5  ;;  %v742_v10 = vadd.f32 %v2374_v58, %v741_v39  ;;  %v942_v11 = vadd.f32 %v2374_v58, %v941_v43 }
 0x136   : > { %v1559_v13 = vld [vmem:[#allocation3 + $0x2a] sm:$0xff]  ;;  %v1560_v14 = vld [vmem:[#allocation3 + $0x32] sm:$0x3f]  ;;  %v1483_v15 = vmax.f32 %v1320_v35, %v1418_v9  ;;  %v1894_v16 = vpop.f32.mrf.mxu0  ;;  %v1994_v17 = vpop.f32.mrf.mxu1 }
 0x137   : > { %v1561_v19 = vmax.f32 %v1557_v7, %v1559_v13  ;;  %v1562_v20 = vmax.f32 %v1558_v12, %v1560_v14  ;;  %v1616_v21 = vld [vmem:[#allocation3 + $0xf6] sm:$0x3f]  ;;  %v1078_v22 = vmax.f32 %v742_v10, 0.0  ;;  %v1128_v23 = vmax.f32 %v942_v11, 0.0 }
 0x138   : > { %v1618_v24 = vmax.f32 %v1614_v18, %v1616_v21  ;;  %1532 = vst [vmem:[#allocation3 + $0x100] sm:$0xff] %v1483_v15  ;;  %v744_v25 = vpop.f32.mrf.mxu0  ;;  %v944_v26 = vpop.f32.mrf.mxu1 }
 0x139   : > { %1563 = vst [vmem:[%s2412_s13 + $0xe] sm:$0xff] %v1561_v19  ;;  %1564 = vst [vmem:[%s2412_s13 + $0x16] sm:$0x3f] %v1562_v20  ;;  %v745_v29 = vadd.f32 %v2374_v58, %v744_v25  ;;  %v945_v30 = vadd.f32 %v2374_v58, %v944_v26 }
 0x13a   : > { %1176 = vst [vmem:[#allocation2 + $0x90] sm:$0xff] %v1078_v22  ;;  %1226 = vst [vmem:[#allocation2 + $0x220] sm:$0xff] %v1128_v23  ;;  %v1895_v31 = vpop.f32.mrf.mxu0  ;;  %v1995_v33 = vpop.f32.mrf.mxu1 }
 0x13b   : > { %1620 = vst [vmem:[%s2412_s13 + $0x78] sm:$0x3f] %v1618_v24  ;;  %v1079_v34 = vmax.f32 %v745_v29, 0.0  ;;  %v1129_v36 = vmax.f32 %v945_v30, 0.0 }
 0x13c   : > { %v1272_v37 = vld [vmem:[#allocation2 + $0x80] ss:$2 sm:$0xff]  ;;  %v1370_v38 = vld [vmem:[#allocation2 + $0x81] ss:$2 sm:$0xff]  ;;  %v1322_v40 = vld [vmem:[#allocation2 + $0x210] ss:$2 sm:$0xff]  ;;  %v749_v41 = vpop.f32.mrf.mxu0  ;;  %v949_v42 = vpop.f32.mrf.mxu1 }
 0x13d   : > { %v1459_v44 = vmax.f32 %v1272_v37, %v1370_v38  ;;  %v1420_v45 = vld [vmem:[#allocation2 + $0x211] ss:$2 sm:$0xff]  ;;  %1177 = vst [vmem:[#allocation2 + $0x98] sm:$0xff] %v1079_v34  ;;  %1227 = vst [vmem:[#allocation2 + $0x228] sm:$0xff] %v1129_v36  ;;  %v750_v46 = vadd.f32 %v2374_v58, %v749_v41  ;;  %v950_v47 = vadd.f32 %v2374_v58, %v949_v42 }
 0x13e   : > { %v1484_v48 = vmax.f32 %v1322_v40, %v1420_v45  ;;  %v1898_v49 = vpop.f32.mrf.mxu0  ;;  %v1998_v50 = vpop.f32.mrf.mxu1 }
 0x13f   : > { %1508 = vst [vmem:[#allocation3 + $0x40] sm:$0xff] %v1459_v44  ;;  %v1080_v51 = vmax.f32 %v750_v46, 0.0  ;;  %v1130_v52 = vmax.f32 %v950_v47, 0.0  ;;  %v1621_v34 = vld [vmem:[#allocation3 + $0xfc] sm:$0xff] }
 0x140   : > { %1533 = vst [vmem:[#allocation3 + $0x108] sm:$0xff] %v1484_v48  ;;  %v752_v53 = vpop.f32.mrf.mxu0  ;;  %v952_v54 = vpop.f32.mrf.mxu1 }
 0x141   : > { %1178 = vst [vmem:[#allocation2 + $0xa0] sm:$0xff] %v1080_v51  ;;  %1228 = vst [vmem:[#allocation2 + $0x230] sm:$0xff] %v1130_v52  ;;  %v753_v55 = vadd.f32 %v2374_v58, %v752_v53  ;;  %v953_v56 = vadd.f32 %v2374_v58, %v952_v54 }
 0x142   : > { %v1899_v57 = vpop.f32.mrf.mxu0  ;;  %v1999_v59 = vpop.f32.mrf.mxu1 }
 0x143   : > { %v1081_v27 = vmax.f32 %v753_v55, 0.0  ;;  %v1131_v28 = vmax.f32 %v953_v56, 0.0 }
 0x144   : > { %v1274_v32 = vld [vmem:[#allocation2 + $0x90] ss:$2 sm:$0xff]  ;;  %v1372_v60 = vld [vmem:[#allocation2 + $0x91] ss:$2 sm:$0xff]  ;;  %v1324_v61 = vld [vmem:[#allocation2 + $0x220] ss:$2 sm:$0xff]  ;;  %v757_v62 = vpop.f32.mrf.mxu0  ;;  %v957_v63 = vpop.f32.mrf.mxu1 }
 0x145   : > { %v1460_v0 = vmax.f32 %v1274_v32, %v1372_v60  ;;  %v1422_v2 = vld [vmem:[#allocation2 + $0x221] ss:$2 sm:$0xff]  ;;  %1179 = vst [vmem:[#allocation2 + $0xa8] sm:$0xff] %v1081_v27  ;;  %1229 = vst [vmem:[#allocation2 + $0x238] sm:$0xff] %v1131_v28  ;;  %v758_v3 = vadd.f32 %v2374_v58, %v757_v62  ;;  %v958_v4 = vadd.f32 %v2374_v58, %v957_v63 }
 0x146   : > { %v1485_v5 = vmax.f32 %v1324_v61, %v1422_v2  ;;  %v1902_v35 = vpop.f32.mrf.mxu0  ;;  %v2002_v39 = vpop.f32.mrf.mxu1  ;;  %v1566_v27 = vld [vmem:[#allocation3 + $0x40] sm:$0x3f] }
 0x147   : > { %1509 = vst [vmem:[#allocation3 + $0x48] sm:$0xff] %v1460_v0  ;;  %v1082_v43 = vmax.f32 %v758_v3, 0.0  ;;  %v1132_v7 = vmax.f32 %v958_v4, 0.0  ;;  %v1622_v26 = vld [vmem:[#allocation3 + $0x104] sm:$0x3f] }
 0x148   : > { %1534 = vst [vmem:[#allocation3 + $0x110] sm:$0xff] %v1485_v5  ;;  %v760_v9 = vpop.f32.mrf.mxu0  ;;  %v960_v10 = vpop.f32.mrf.mxu1 }
 0x149   : > { %1180 = vst [vmem:[#allocation2 + $0xb0] sm:$0xff] %v1082_v43  ;;  %1230 = vst [vmem:[#allocation2 + $0x240] sm:$0xff] %v1132_v7  ;;  %v761_v11 = vadd.f32 %v2374_v58, %v760_v9  ;;  %v961_v12 = vadd.f32 %v2374_v58, %v960_v10 }
 0x14a   : > { %v1903_v13 = vpop.f32.mrf.mxu0  ;;  %v2003_v14 = vpop.f32.mrf.mxu1 }
 0x14b   : > { %v1083_v15 = vmax.f32 %v761_v11, 0.0  ;;  %v1133_v16 = vmax.f32 %v961_v12, 0.0 }
 0x14c   : > { %v1276_v17 = vld [vmem:[#allocation2 + $0xa0] ss:$2 sm:$0xff]  ;;  %v1374_v18 = vld [vmem:[#allocation2 + $0xa1] ss:$2 sm:$0xff]  ;;  %v2461_v19 = vld [vmem:[#allocation2 + $0x230] ss:$2 sm:$0xff]  ;;  %v765_v20 = vpop.f32.mrf.mxu0  ;;  %v965_v21 = vpop.f32.mrf.mxu1 }
 0x14d   : > { %v1461_v22 = vmax.f32 %v1276_v17, %v1374_v18  ;;  %v2463_v23 = vld [vmem:[#allocation2 + $0x231] ss:$2 sm:$0xff]  ;;  %1181 = vst [vmem:[#allocation2 + $0xb8] sm:$0xff] %v1083_v15  ;;  %1231 = vst [vmem:[#allocation2 + $0x248] sm:$0xff] %v1133_v16  ;;  %v766_v24 = vadd.f32 %v2374_v58, %v765_v20  ;;  %v966_v25 = vadd.f32 %v2374_v58, %v965_v21 }
 0x14e   : > { %v1567_v29 = vld [vmem:[#allocation3 + $0x46] sm:$0xff]  ;;  %v1486_v30 = vmax.f32 %v2461_v19, %v2463_v23  ;;  %v1906_v31 = vpop.f32.mrf.mxu0  ;;  %v2006_v33 = vpop.f32.mrf.mxu1 }
 0x14f   : > { %v1569_v36 = vmax.f32 %v1458_v8, %v1567_v29  ;;  %v1623_v37 = vld [vmem:[#allocation3 + $0x10a] sm:$0xff]  ;;  %v1624_v38 = vld [vmem:[#allocation3 + $0x112] sm:$0x3f]  ;;  %1510 = vst [vmem:[#allocation3 + $0x50] sm:$0xff] %v1461_v22  ;;  %v1084_v40 = vmax.f32 %v766_v24, 0.0  ;;  %v1134_v41 = vmax.f32 %v966_v25, 0.0 }
 0x150   : > { %v1625_v42 = vmax.f32 %v1621_v34, %v1623_v37  ;;  %v1626_v44 = vmax.f32 %v1622_v26, %v1624_v38  ;;  %v768_v45 = vpop.f32.mrf.mxu0  ;;  %v968_v46 = vpop.f32.mrf.mxu1 }
 0x151   : > { %1571 = vst [vmem:[%s2412_s13 + $0x1c] sm:$0xff] %v1569_v36  ;;  %1182 = vst [vmem:[#allocation2 + $0xc0] sm:$0xff] %v1084_v40  ;;  %v769_v47 = vadd.f32 %v2374_v58, %v768_v45  ;;  %v969_v48 = vadd.f32 %v2374_v58, %v968_v46 }
 0x152   : > { %1232 = vst [vmem:[#allocation2 + $0x250] sm:$0xff] %v1134_v41  ;;  %1627 = vst [vmem:[%s2412_s13 + $0x7e] sm:$0xff] %v1625_v42  ;;  %v1907_v1 = vpop.f32.mrf.mxu0  ;;  %v2007_v6 = vpop.f32.mrf.mxu1 }
 0x153   : > { %1628 = vst [vmem:[%s2412_s13 + $0x86] sm:$0x3f] %v1626_v44  ;;  %v1085_v8 = vmax.f32 %v769_v47, 0.0  ;;  %v1135_v49 = vmax.f32 %v969_v48, 0.0 }
 0x154   : > { %v1278_v50 = vld [vmem:[#allocation2 + $0xb0] ss:$2 sm:$0xff]  ;;  %v1376_v51 = vld [vmem:[#allocation2 + $0xb1] ss:$2 sm:$0xff]  ;;  %v1328_v52 = vld [vmem:[#allocation2 + $0x240] ss:$2 sm:$0xff]  ;;  %v773_v53 = vpop.f32.mrf.mxu0  ;;  %v973_v54 = vpop.f32.mrf.mxu1 }
 0x155   : > { %v1462_v55 = vmax.f32 %v1278_v50, %v1376_v51  ;;  %v1426_v56 = vld [vmem:[#allocation2 + $0x241] ss:$2 sm:$0xff]  ;;  %1183 = vst [vmem:[#allocation2 + $0xc8] sm:$0xff] %v1085_v8  ;;  %1233 = vst [vmem:[#allocation2 + $0x258] sm:$0xff] %v1135_v49  ;;  %v774_v57 = vadd.f32 %v2374_v58, %v773_v53  ;;  %v974_v59 = vadd.f32 %v2374_v58, %v973_v54 }
 0x156   : > { %v1568_v28 = vld [vmem:[#allocation3 + $0x4e] sm:$0x3f]  ;;  %v1487_v32 = vmax.f32 %v1328_v52, %v1426_v56  ;;  %v1910_v60 = vpop.f32.mrf.mxu0  ;;  %v2010_v61 = vpop.f32.mrf.mxu1 }
 0x157   : > { %v1570_v62 = vmax.f32 %v1566_v27, %v1568_v28  ;;  %1511 = vst [vmem:[#allocation3 + $0x58] sm:$0xff] %v1462_v55  ;;  %v1086_v63 = vmax.f32 %v774_v57, 0.0  ;;  %v1136_v0 = vmax.f32 %v974_v59, 0.0 }
 0x158   : > { %1536 = vst [vmem:[#allocation3 + $0x120] sm:$0xff] %v1487_v32  ;;  %v776_v2 = vpop.f32.mrf.mxu0  ;;  %v976_v3 = vpop.f32.mrf.mxu1 }
 0x159   : > { %1572 = vst [vmem:[%s2412_s13 + $0x24] sm:$0x3f] %v1570_v62  ;;  %1184 = vst [vmem:[#allocation2 + $0xd0] sm:$0xff] %v1086_v63  ;;  %v777_v4 = vadd.f32 %v2374_v58, %v776_v2  ;;  %v977_v5 = vadd.f32 %v2374_v58, %v976_v3 }
 0x15a   : > { %1234 = vst [vmem:[#allocation2 + $0x260] sm:$0xff] %v1136_v0  ;;  %v1911_v35 = vpop.f32.mrf.mxu0  ;;  %v2011_v39 = vpop.f32.mrf.mxu1 }
 0x15b   : > { %v1087_v43 = vmax.f32 %v777_v4, 0.0  ;;  %v1137_v7 = vmax.f32 %v977_v5, 0.0 }
 0x15c   : > { %v1280_v9 = vld [vmem:[#allocation2 + $0xc0] ss:$2 sm:$0xff]  ;;  %v1378_v10 = vld [vmem:[#allocation2 + $0xc1] ss:$2 sm:$0xff]  ;;  %v1330_v11 = vld [vmem:[#allocation2 + $0x250] ss:$2 sm:$0xff]  ;;  %v781_v12 = vpop.f32.mrf.mxu0  ;;  %v981_v13 = vpop.f32.mrf.mxu1 }
 0x15d   : > { %v1463_v14 = vmax.f32 %v1280_v9, %v1378_v10  ;;  %v1428_v15 = vld [vmem:[#allocation2 + $0x251] ss:$2 sm:$0xff]  ;;  %1185 = vst [vmem:[#allocation2 + $0xd8] sm:$0xff] %v1087_v43  ;;  %1235 = vst [vmem:[#allocation2 + $0x268] sm:$0xff] %v1137_v7  ;;  %v782_v16 = vadd.f32 %v2374_v58, %v781_v12  ;;  %v982_v17 = vadd.f32 %v2374_v58, %v981_v13 }
 0x15e   : > { %v1488_v18 = vmax.f32 %v1330_v11, %v1428_v15  ;;  %v1914_v20 = vpop.f32.mrf.mxu0  ;;  %v2014_v21 = vpop.f32.mrf.mxu1  ;;  %v1573_v61 = vld [vmem:[#allocation3 + $0x54] sm:$0xff] }
 0x15f   : > { %1512 = vst [vmem:[#allocation3 + $0x60] sm:$0xff] %v1463_v14  ;;  %v1088_v22 = vmax.f32 %v782_v16, 0.0  ;;  %v1138_v24 = vmax.f32 %v982_v17, 0.0  ;;  %v1630_v7 = vld [vmem:[#allocation3 + $0x120] sm:$0x3f] }
 0x160   : > { %1537 = vst [vmem:[#allocation3 + $0x128] sm:$0xff] %v1488_v18  ;;  %v784_v25 = vpop.f32.mrf.mxu0  ;;  %v984_v26 = vpop.f32.mrf.mxu1  ;;  %v2508_v18 = vld [vmem:[%s2581_s2] ss:$0 sm:$0xff] }
 0x161   : > { %1186 = vst [vmem:[#allocation2 + $0xe0] sm:$0xff] %v1088_v22  ;;  %1236 = vst [vmem:[#allocation2 + $0x270] sm:$0xff] %v1138_v24  ;;  %v785_v29 = vadd.f32 %v2374_v58, %v784_v25  ;;  %v985_v31 = vadd.f32 %v2374_v58, %v984_v26 }
 0x162   : > { %v1915_v33 = vpop.f32.mrf.mxu0  ;;  %v2015_v34 = vpop.f32.mrf.mxu1 }
 0x163   : > { %v1089_v36 = vmax.f32 %v785_v29, 0.0  ;;  %v1139_v37 = vmax.f32 %v985_v31, 0.0 }
 0x164   : > { %v1282_v38 = vld [vmem:[#allocation2 + $0xd0] ss:$2 sm:$0xff]  ;;  %v1380_v40 = vld [vmem:[#allocation2 + $0xd1] ss:$2 sm:$0xff]  ;;  %v1332_v41 = vld [vmem:[#allocation2 + $0x260] ss:$2 sm:$0xff]  ;;  %v789_v42 = vpop.f32.mrf.mxu0  ;;  %v989_v44 = vpop.f32.mrf.mxu1 }
 0x165   : > { %v1464_v45 = vmax.f32 %v1282_v38, %v1380_v40  ;;  %v1430_v46 = vld [vmem:[#allocation2 + $0x261] ss:$2 sm:$0xff]  ;;  %1187 = vst [vmem:[#allocation2 + $0xe8] sm:$0xff] %v1089_v36  ;;  %1237 = vst [vmem:[#allocation2 + $0x278] sm:$0xff] %v1139_v37  ;;  %v790_v47 = vadd.f32 %v2374_v58, %v789_v42  ;;  %v990_v48 = vadd.f32 %v2374_v58, %v989_v44 }
 0x166   : > { %v1489_v1 = vmax.f32 %v1332_v41, %v1430_v46  ;;  %v1918_v6 = vpop.f32.mrf.mxu0  ;;  %v2018_v8 = vpop.f32.mrf.mxu1  ;;  %v1574_v3 = vld [vmem:[#allocation3 + $0x5c] sm:$0x3f] }
 0x167   : > { %v1631_v49 = vld [vmem:[#allocation3 + $0x126] sm:$0xff]  ;;  %1513 = vst [vmem:[#allocation3 + $0x68] sm:$0xff] %v1464_v45  ;;  %v1090_v50 = vmax.f32 %v790_v47, 0.0  ;;  %v1140_v51 = vmax.f32 %v990_v48, 0.0 }
 0x168   : > { %v1633_v52 = vmax.f32 %v1486_v30, %v1631_v49  ;;  %1538 = vst [vmem:[#allocation3 + $0x130] sm:$0xff] %v1489_v1  ;;  %v792_v53 = vpop.f32.mrf.mxu0  ;;  %v992_v54 = vpop.f32.mrf.mxu1 }
 0x169   : > { %1188 = vst [vmem:[#allocation2 + $0xf0] sm:$0xff] %v1090_v50  ;;  %1238 = vst [vmem:[#allocation2 + $0x280] sm:$0xff] %v1140_v51  ;;  %v793_v55 = vadd.f32 %v2374_v58, %v792_v53  ;;  %v993_v56 = vadd.f32 %v2374_v58, %v992_v54 }
 0x16a   : > { %1635 = vst [vmem:[%s2412_s13 + $0x8c] sm:$0xff] %v1633_v52  ;;  %v1919_v57 = vpop.f32.mrf.mxu0  ;;  %v2019_v59 = vpop.f32.mrf.mxu1 }
 0x16b   : > { %v1091_v27 = vmax.f32 %v793_v55, 0.0  ;;  %v1141_v28 = vmax.f32 %v993_v56, 0.0 }
 0x16c   : > { %v2494_v32 = vld [vmem:[#allocation2 + $0xe0] ss:$2 sm:$0xff]  ;;  %v2496_v60 = vld [vmem:[#allocation2 + $0xe1] ss:$2 sm:$0xff]  ;;  %v1334_v19 = vld [vmem:[#allocation2 + $0x270] ss:$2 sm:$0xff]  ;;  %v797_v23 = vpop.f32.mrf.mxu0  ;;  %v997_v30 = vpop.f32.mrf.mxu1 }
 0x16d   : > { %v1465_v62 = vmax.f32 %v2494_v32, %v2496_v60  ;;  %v1432_v63 = vld [vmem:[#allocation2 + $0x271] ss:$2 sm:$0xff]  ;;  %1189 = vst [vmem:[#allocation2 + $0xf8] sm:$0xff] %v1091_v27  ;;  %1239 = vst [vmem:[#allocation2 + $0x288] sm:$0xff] %v1141_v28  ;;  %v798_v0 = vadd.f32 %v2374_v58, %v797_v23  ;;  %v998_v2 = vadd.f32 %v2374_v58, %v997_v30 }
 0x16e   : > { %v1575_v4 = vld [vmem:[#allocation3 + $0x62] sm:$0xff]  ;;  %v1576_v5 = vld [vmem:[#allocation3 + $0x6a] sm:$0x3f]  ;;  %v1490_v35 = vmax.f32 %v1334_v19, %v1432_v63  ;;  %v1922_v39 = vpop.f32.mrf.mxu0  ;;  %v2022_v43 = vpop.f32.mrf.mxu1 }
 0x16f   : > { %v1577_v9 = vmax.f32 %v1573_v61, %v1575_v4  ;;  %v1578_v10 = vmax.f32 %v1574_v3, %v1576_v5  ;;  %v1632_v11 = vld [vmem:[#allocation3 + $0x12e] sm:$0x3f]  ;;  %v1092_v12 = vmax.f32 %v798_v0, 0.0  ;;  %v1142_v13 = vmax.f32 %v998_v2, 0.0 }
 0x170   : > { %v1634_v14 = vmax.f32 %v1630_v7, %v1632_v11  ;;  %1539 = vst [vmem:[#allocation3 + $0x138] sm:$0xff] %v1490_v35  ;;  %v800_v15 = vpop.f32.mrf.mxu0  ;;  %v1000_v16 = vpop.f32.mrf.mxu1 }
 0x171   : > { %1579 = vst [vmem:[%s2412_s13 + $0x2a] sm:$0xff] %v1577_v9  ;;  %1580 = vst [vmem:[%s2412_s13 + $0x32] sm:$0x3f] %v1578_v10  ;;  %v801_v17 = vadd.f32 %v2374_v58, %v800_v15  ;;  %v1001_v20 = vadd.f32 %v2508_v18, %v1000_v16 }
 0x172   : > { %1190 = vst [vmem:[#allocation2 + $0x100] sm:$0xff] %v1092_v12  ;;  %1240 = vst [vmem:[#allocation2 + $0x290] sm:$0xff] %v1142_v13  ;;  %v1923_v21 = vpop.f32.mrf.mxu0  ;;  %v2023_v22 = vpop.f32.mrf.mxu1 }
 0x173   : > { %1636 = vst [vmem:[%s2412_s13 + $0x94] sm:$0x3f] %v1634_v14  ;;  %v1093_v24 = vmax.f32 %v801_v17, 0.0  ;;  %v1143_v25 = vmax.f32 %v1001_v20, 0.0 }
 0x174   : > { %v1286_v26 = vld [vmem:[#allocation2 + $0xf0] ss:$2 sm:$0xff]  ;;  %v1384_v29 = vld [vmem:[#allocation2 + $0xf1] ss:$2 sm:$0xff]  ;;  %v1336_v31 = vld [vmem:[#allocation2 + $0x280] ss:$2 sm:$0xff]  ;;  %v805_v33 = vpop.f32.mrf.mxu0  ;;  %v1005_v34 = vpop.f32.mrf.mxu1 }
 0x175   : > { %v1466_v36 = vmax.f32 %v1286_v26, %v1384_v29  ;;  %v1434_v37 = vld [vmem:[#allocation2 + $0x281] ss:$2 sm:$0xff]  ;;  %1191 = vst [vmem:[#allocation2 + $0x108] sm:$0xff] %v1093_v24  ;;  %1241 = vst [vmem:[#allocation2 + $0x298] sm:$0xff] %v1143_v25  ;;  %v806_v58 = vadd.f32 %v2508_v18, %v805_v33  ;;  %v1006_v38 = vadd.f32 %v2508_v18, %v1005_v34 }
 0x176   : > { %v1491_v40 = vmax.f32 %v1336_v31, %v1434_v37  ;;  %v1926_v41 = vpop.f32.mrf.mxu0  ;;  %v2026_v42 = vpop.f32.mrf.mxu1 }
 0x177   : > { %1515 = vst [vmem:[#allocation3 + $0x78] sm:$0xff] %v1466_v36  ;;  %v1094_v44 = vmax.f32 %v806_v58, 0.0  ;;  %v1144_v45 = vmax.f32 %v1006_v38, 0.0  ;;  %v1637_v24 = vld [vmem:[#allocation3 + $0x134] sm:$0xff] }
 0x178   : > { %1540 = vst [vmem:[#allocation3 + $0x140] sm:$0xff] %v1491_v40  ;;  %v808_v46 = vpop.f32.mrf.mxu0  ;;  %v1008_v47 = vpop.f32.mrf.mxu1 }
 0x179   : > { %1192 = vst [vmem:[#allocation2 + $0x110] sm:$0xff] %v1094_v44  ;;  %1242 = vst [vmem:[#allocation2 + $0x2a0] sm:$0xff] %v1144_v45  ;;  %v809_v48 = vadd.f32 %v2508_v18, %v808_v46  ;;  %v1009_v1 = vadd.f32 %v2508_v18, %v1008_v47 }
 0x17a   : > { %v1927_v6 = vpop.f32.mrf.mxu0  ;;  %v2027_v8 = vpop.f32.mrf.mxu1 }
 0x17b   : > { %v1095_v49 = vmax.f32 %v809_v48, 0.0  ;;  %v1145_v50 = vmax.f32 %v1009_v1, 0.0 }
 0x17c   : > { %v1288_v51 = vld [vmem:[#allocation2 + $0x100] ss:$2 sm:$0xff]  ;;  %v1386_v52 = vld [vmem:[#allocation2 + $0x101] ss:$2 sm:$0xff]  ;;  %v1338_v53 = vld [vmem:[#allocation2 + $0x290] ss:$2 sm:$0xff]  ;;  %v813_v54 = vpop.f32.mrf.mxu0  ;;  %v1013_v55 = vpop.f32.mrf.mxu1 }
 0x17d   : > { %v1467_v56 = vmax.f32 %v1288_v51, %v1386_v52  ;;  %v1436_v57 = vld [vmem:[#allocation2 + $0x291] ss:$2 sm:$0xff]  ;;  %1193 = vst [vmem:[#allocation2 + $0x118] sm:$0xff] %v1095_v49  ;;  %1243 = vst [vmem:[#allocation2 + $0x2a8] sm:$0xff] %v1145_v50  ;;  %v814_v59 = vadd.f32 %v2508_v18, %v813_v54  ;;  %v1014_v27 = vadd.f32 %v2508_v18, %v1013_v55 }
 0x17e   : > { %v1492_v28 = vmax.f32 %v1338_v53, %v1436_v57  ;;  %v1930_v19 = vpop.f32.mrf.mxu0  ;;  %v2030_v23 = vpop.f32.mrf.mxu1  ;;  %v1582_v49 = vld [vmem:[#allocation3 + $0x78] sm:$0x3f] }
 0x17f   : > { %1516 = vst [vmem:[#allocation3 + $0x80] sm:$0xff] %v1467_v56  ;;  %v1096_v30 = vmax.f32 %v814_v59, 0.0  ;;  %v1146_v61 = vmax.f32 %v1014_v27, 0.0  ;;  %v1638_v16 = vld [vmem:[#allocation3 + $0x13c] sm:$0x3f] }
 0x180   : > { %1541 = vst [vmem:[#allocation3 + $0x148] sm:$0xff] %v1492_v28  ;;  %v816_v63 = vpop.f32.mrf.mxu0  ;;  %v1016_v0 = vpop.f32.mrf.mxu1 }
 0x181   : > { %1194 = vst [vmem:[#allocation2 + $0x120] sm:$0xff] %v1096_v30  ;;  %1244 = vst [vmem:[#allocation2 + $0x2b0] sm:$0xff] %v1146_v61  ;;  %v817_v2 = vadd.f32 %v2508_v18, %v816_v63  ;;  %v1017_v3 = vadd.f32 %v2508_v18, %v1016_v0 }
 0x182   : > { %v1931_v4 = vpop.f32.mrf.mxu0  ;;  %v2031_v5 = vpop.f32.mrf.mxu1 }
 0x183   : > { %v1097_v35 = vmax.f32 %v817_v2, 0.0  ;;  %v1147_v39 = vmax.f32 %v1017_v3, 0.0 }
 0x184   : > { %v1290_v43 = vld [vmem:[#allocation2 + $0x110] ss:$2 sm:$0xff]  ;;  %v1388_v7 = vld [vmem:[#allocation2 + $0x111] ss:$2 sm:$0xff]  ;;  %v2520_v9 = vld [vmem:[#allocation2 + $0x2a0] ss:$2 sm:$0xff]  ;;  %v821_v10 = vpop.f32.mrf.mxu0  ;;  %v1021_v11 = vpop.f32.mrf.mxu1 }
 0x185   : > { %v1468_v12 = vmax.f32 %v1290_v43, %v1388_v7  ;;  %v2522_v13 = vld [vmem:[#allocation2 + $0x2a1] ss:$2 sm:$0xff]  ;;  %1195 = vst [vmem:[#allocation2 + $0x128] sm:$0xff] %v1097_v35  ;;  %1245 = vst [vmem:[#allocation2 + $0x2b8] sm:$0xff] %v1147_v39  ;;  %v822_v14 = vadd.f32 %v2508_v18, %v821_v10  ;;  %v1022_v15 = vadd.f32 %v2508_v18, %v1021_v11 }
 0x186   : > { %v1583_v17 = vld [vmem:[#allocation3 + $0x7e] sm:$0xff]  ;;  %v1493_v20 = vmax.f32 %v2520_v9, %v2522_v13  ;;  %v1934_v21 = vpop.f32.mrf.mxu0  ;;  %v2034_v22 = vpop.f32.mrf.mxu1 }
 0x187   : > { %v1585_v25 = vmax.f32 %v1465_v62, %v1583_v17  ;;  %v1639_v26 = vld [vmem:[#allocation3 + $0x142] sm:$0xff]  ;;  %v1640_v29 = vld [vmem:[#allocation3 + $0x14a] sm:$0x3f]  ;;  %1517 = vst [vmem:[#allocation3 + $0x88] sm:$0xff] %v1468_v12  ;;  %v1098_v31 = vmax.f32 %v822_v14, 0.0  ;;  %v1148_v33 = vmax.f32 %v1022_v15, 0.0 }
 0x188   : > { %v1641_v34 = vmax.f32 %v1637_v24, %v1639_v26  ;;  %v1642_v36 = vmax.f32 %v1638_v16, %v1640_v29  ;;  %v824_v37 = vpop.f32.mrf.mxu0  ;;  %v1024_v58 = vpop.f32.mrf.mxu1 }
 0x189   : > { %1587 = vst [vmem:[%s2412_s13 + $0x38] sm:$0xff] %v1585_v25  ;;  %1196 = vst [vmem:[#allocation2 + $0x130] sm:$0xff] %v1098_v31  ;;  %v825_v38 = vadd.f32 %v2508_v18, %v824_v37  ;;  %v1025_v40 = vadd.f32 %v2508_v18, %v1024_v58 }
 0x18a   : > { %1246 = vst [vmem:[#allocation2 + $0x2c0] sm:$0xff] %v1148_v33  ;;  %1643 = vst [vmem:[%s2412_s13 + $0x9a] sm:$0xff] %v1641_v34  ;;  %v1935_v32 = vpop.f32.mrf.mxu0  ;;  %v2035_v60 = vpop.f32.mrf.mxu1 }
 0x18b   : > { %1644 = vst [vmem:[%s2412_s13 + $0xa2] sm:$0x3f] %v1642_v36  ;;  %v1099_v62 = vmax.f32 %v825_v38, 0.0  ;;  %v1149_v41 = vmax.f32 %v1025_v40, 0.0 }
 0x18c   : > { %v1292_v42 = vld [vmem:[#allocation2 + $0x120] ss:$2 sm:$0xff]  ;;  %v1390_v44 = vld [vmem:[#allocation2 + $0x121] ss:$2 sm:$0xff]  ;;  %v1342_v45 = vld [vmem:[#allocation2 + $0x2b0] ss:$2 sm:$0xff]  ;;  %v829_v46 = vpop.f32.mrf.mxu0  ;;  %v1029_v47 = vpop.f32.mrf.mxu1 }
 0x18d   : > { %v1469_v48 = vmax.f32 %v1292_v42, %v1390_v44  ;;  %v1440_v1 = vld [vmem:[#allocation2 + $0x2b1] ss:$2 sm:$0xff]  ;;  %1197 = vst [vmem:[#allocation2 + $0x138] sm:$0xff] %v1099_v62  ;;  %1247 = vst [vmem:[#allocation2 + $0x2c8] sm:$0xff] %v1149_v41  ;;  %v830_v6 = vadd.f32 %v2508_v18, %v829_v46  ;;  %v1030_v8 = vadd.f32 %v2508_v18, %v1029_v47 }
 0x18e   : > { %v1584_v50 = vld [vmem:[#allocation3 + $0x86] sm:$0x3f]  ;;  %v1494_v51 = vmax.f32 %v1342_v45, %v1440_v1  ;;  %v1938_v52 = vpop.f32.mrf.mxu0  ;;  %v2038_v53 = vpop.f32.mrf.mxu1 }
 0x18f   : > { %v1586_v54 = vmax.f32 %v1582_v49, %v1584_v50  ;;  %1518 = vst [vmem:[#allocation3 + $0x90] sm:$0xff] %v1469_v48  ;;  %v1100_v55 = vmax.f32 %v830_v6, 0.0  ;;  %v1150_v56 = vmax.f32 %v1030_v8, 0.0 }
 0x190   : > { %1543 = vst [vmem:[#allocation3 + $0x158] sm:$0xff] %v1494_v51  ;;  %v832_v57 = vpop.f32.mrf.mxu0  ;;  %v1032_v59 = vpop.f32.mrf.mxu1 }
 0x191   : > { %1588 = vst [vmem:[%s2412_s13 + $0x40] sm:$0x3f] %v1586_v54  ;;  %1198 = vst [vmem:[#allocation2 + $0x140] sm:$0xff] %v1100_v55  ;;  %v833_v27 = vadd.f32 %v2508_v18, %v832_v57  ;;  %v1033_v28 = vadd.f32 %v2508_v18, %v1032_v59 }
 0x192   : > { %1248 = vst [vmem:[#allocation2 + $0x2d0] sm:$0xff] %v1150_v56  ;;  %v1939_v19 = vpop.f32.mrf.mxu0  ;;  %v2039_v23 = vpop.f32.mrf.mxu1 }
 0x193   : > { %v1101_v30 = vmax.f32 %v833_v27, 0.0  ;;  %v1151_v61 = vmax.f32 %v1033_v28, 0.0 }
 0x194   : > { %v1294_v63 = vld [vmem:[#allocation2 + $0x130] ss:$2 sm:$0xff]  ;;  %v1392_v0 = vld [vmem:[#allocation2 + $0x131] ss:$2 sm:$0xff]  ;;  %v1344_v2 = vld [vmem:[#allocation2 + $0x2c0] ss:$2 sm:$0xff]  ;;  %v837_v3 = vpop.f32.mrf.mxu0  ;;  %v1037_v4 = vpop.f32.mrf.mxu1 }
 0x195   : > { %v1470_v5 = vmax.f32 %v1294_v63, %v1392_v0  ;;  %v1442_v35 = vld [vmem:[#allocation2 + $0x2c1] ss:$2 sm:$0xff]  ;;  %1199 = vst [vmem:[#allocation2 + $0x148] sm:$0xff] %v1101_v30  ;;  %1249 = vst [vmem:[#allocation2 + $0x2d8] sm:$0xff] %v1151_v61  ;;  %v838_v39 = vadd.f32 %v2508_v18, %v837_v3  ;;  %v1038_v43 = vadd.f32 %v2508_v18, %v1037_v4 }
 0x196   : > { %v1495_v7 = vmax.f32 %v1344_v2, %v1442_v35  ;;  %v1942_v10 = vpop.f32.mrf.mxu0  ;;  %v2042_v11 = vpop.f32.mrf.mxu1  ;;  %v1589_v53 = vld [vmem:[#allocation3 + $0x8c] sm:$0xff] }
 0x197   : > { %1519 = vst [vmem:[#allocation3 + $0x98] sm:$0xff] %v1470_v5  ;;  %v1102_v12 = vmax.f32 %v838_v39, 0.0  ;;  %v1152_v14 = vmax.f32 %v1038_v43, 0.0  ;;  %v1646_v61 = vld [vmem:[#allocation3 + $0x158] sm:$0x3f] }
 0x198   : > { %1544 = vst [vmem:[#allocation3 + $0x160] sm:$0xff] %v1495_v7  ;;  %v840_v15 = vpop.f32.mrf.mxu0  ;;  %v1040_v16 = vpop.f32.mrf.mxu1 }
 0x199   : > { %1200 = vst [vmem:[#allocation2 + $0x150] sm:$0xff] %v1102_v12  ;;  %1250 = vst [vmem:[#allocation2 + $0x2e0] sm:$0xff] %v1152_v14  ;;  %v841_v17 = vadd.f32 %v2508_v18, %v840_v15  ;;  %v1041_v21 = vadd.f32 %v2508_v18, %v1040_v16 }
 0x19a   : > { %v1943_v22 = vpop.f32.mrf.mxu0  ;;  %v2043_v24 = vpop.f32.mrf.mxu1 }
 0x19b   : > { %v1103_v25 = vmax.f32 %v841_v17, 0.0  ;;  %v1153_v26 = vmax.f32 %v1041_v21, 0.0 }
 0x19c   : > { %v1296_v29 = vld [vmem:[#allocation2 + $0x140] ss:$2 sm:$0xff]  ;;  %v1394_v31 = vld [vmem:[#allocation2 + $0x141] ss:$2 sm:$0xff]  ;;  %v1346_v33 = vld [vmem:[#allocation2 + $0x2d0] ss:$2 sm:$0xff]  ;;  %v845_v34 = vpop.f32.mrf.mxu0  ;;  %v1045_v36 = vpop.f32.mrf.mxu1 }
 0x19d   : > { %v1471_v37 = vmax.f32 %v1296_v29, %v1394_v31  ;;  %v1444_v58 = vld [vmem:[#allocation2 + $0x2d1] ss:$2 sm:$0xff]  ;;  %1201 = vst [vmem:[#allocation2 + $0x158] sm:$0xff] %v1103_v25  ;;  %1251 = vst [vmem:[#allocation2 + $0x2e8] sm:$0xff] %v1153_v26  ;;  %v846_v38 = vadd.f32 %v2508_v18, %v845_v34  ;;  %v1046_v40 = vadd.f32 %v2508_v18, %v1045_v36 }
 0x19e   : > { %v1496_v32 = vmax.f32 %v1346_v33, %v1444_v58  ;;  %v1946_v60 = vpop.f32.mrf.mxu0  ;;  %v2046_v62 = vpop.f32.mrf.mxu1  ;;  %v1590_v59 = vld [vmem:[#allocation3 + $0x94] sm:$0x3f] }
 0x19f   : > { %v1647_v41 = vld [vmem:[#allocation3 + $0x15e] sm:$0xff]  ;;  %1520 = vst [vmem:[#allocation3 + $0xa0] sm:$0xff] %v1471_v37  ;;  %v1104_v42 = vmax.f32 %v846_v38, 0.0  ;;  %v1154_v44 = vmax.f32 %v1046_v40, 0.0 }
 0x1a0   : > { %v1649_v45 = vmax.f32 %v1493_v20, %v1647_v41  ;;  %1545 = vst [vmem:[#allocation3 + $0x168] sm:$0xff] %v1496_v32  ;;  %v848_v46 = vpop.f32.mrf.mxu0  ;;  %v1048_v47 = vpop.f32.mrf.mxu1 }
 0x1a1   : > { %1202 = vst [vmem:[#allocation2 + $0x160] sm:$0xff] %v1104_v42  ;;  %1252 = vst [vmem:[#allocation2 + $0x2f0] sm:$0xff] %v1154_v44  ;;  %v849_v48 = vadd.f32 %v2508_v18, %v848_v46  ;;  %v1049_v1 = vadd.f32 %v2508_v18, %v1048_v47 }
 0x1a2   : > { %1651 = vst [vmem:[%s2412_s13 + $0xa8] sm:$0xff] %v1649_v45  ;;  %v1947_v6 = vpop.f32.mrf.mxu0  ;;  %v2047_v8 = vpop.f32.mrf.mxu1 }
 0x1a3   : > { %v1105_v49 = vmax.f32 %v849_v48, 0.0  ;;  %v1155_v50 = vmax.f32 %v1049_v1, 0.0 }
 0x1a4   : > { %v2553_v51 = vld [vmem:[#allocation2 + $0x150] ss:$2 sm:$0xff]  ;;  %v2555_v52 = vld [vmem:[#allocation2 + $0x151] ss:$2 sm:$0xff]  ;;  %v1348_v9 = vld [vmem:[#allocation2 + $0x2e0] ss:$2 sm:$0xff]  ;;  %v853_v13 = vpop.f32.mrf.mxu0  ;;  %v1053_v20 = vpop.f32.mrf.mxu1 }
 0x1a5   : > { %v1472_v54 = vmax.f32 %v2553_v51, %v2555_v52  ;;  %v1446_v55 = vld [vmem:[#allocation2 + $0x2e1] ss:$2 sm:$0xff]  ;;  %1203 = vst [vmem:[#allocation2 + $0x168] sm:$0xff] %v1105_v49  ;;  %1253 = vst [vmem:[#allocation2 + $0x2f8] sm:$0xff] %v1155_v50  ;;  %v854_v56 = vadd.f32 %v2508_v18, %v853_v13  ;;  %v1054_v57 = vadd.f32 %v2508_v18, %v1053_v20 }
 0x1a6   : > { %v1591_v27 = vld [vmem:[#allocation3 + $0x9a] sm:$0xff]  ;;  %v1592_v28 = vld [vmem:[#allocation3 + $0xa2] sm:$0x3f]  ;;  %v1497_v19 = vmax.f32 %v1348_v9, %v1446_v55  ;;  %v1950_v23 = vpop.f32.mrf.mxu0  ;;  %v2050_v30 = vpop.f32.mrf.mxu1  ;;  %v1607_v49 = vld [vmem:[#allocation3 + $0xd2] sm:$0xff] }
 0x1a7   : > { %v1593_v63 = vmax.f32 %v1589_v53, %v1591_v27  ;;  %v1594_v0 = vmax.f32 %v1590_v59, %v1592_v28  ;;  %v1648_v2 = vld [vmem:[#allocation3 + $0x166] sm:$0x3f]  ;;  %v1106_v3 = vmax.f32 %v854_v56, 0.0  ;;  %v1156_v4 = vmax.f32 %v1054_v57, 0.0 }
 0x1a8   : > { %v1650_v5 = vmax.f32 %v1646_v61, %v1648_v2  ;;  %1546 = vst [vmem:[#allocation3 + $0x170] sm:$0xff] %v1497_v19  ;;  %v856_v35 = vpop.f32.mrf.mxu0  ;;  %v1056_v39 = vpop.f32.mrf.mxu1 }
 0x1a9   : > { %1595 = vst [vmem:[%s2412_s13 + $0x46] sm:$0xff] %v1593_v63  ;;  %1596 = vst [vmem:[%s2412_s13 + $0x4e] sm:$0x3f] %v1594_v0  ;;  %v857_v43 = vadd.f32 %v2508_v18, %v856_v35  ;;  %v1057_v7 = vadd.f32 %v2508_v18, %v1056_v39 }
 0x1aa   : > { %1204 = vst [vmem:[#allocation2 + $0x170] sm:$0xff] %v1106_v3  ;;  %1254 = vst [vmem:[#allocation2 + $0x300] sm:$0xff] %v1156_v4  ;;  %v1951_v10 = vpop.f32.mrf.mxu0  ;;  %v2051_v11 = vpop.f32.mrf.mxu1 }
 0x1ab   : > { %1652 = vst [vmem:[%s2412_s13 + $0xb0] sm:$0x3f] %v1650_v5  ;;  %v1107_v12 = vmax.f32 %v857_v43, 0.0  ;;  %v1157_v14 = vmax.f32 %v1057_v7, 0.0 }
 0x1ac   : > { %v1300_v15 = vld [vmem:[#allocation2 + $0x160] ss:$2 sm:$0xff]  ;;  %v1398_v16 = vld [vmem:[#allocation2 + $0x161] ss:$2 sm:$0xff]  ;;  %v1350_v17 = vld [vmem:[#allocation2 + $0x2f0] ss:$2 sm:$0xff]  ;;  %v861_v21 = vpop.f32.mrf.mxu0 }
 0x1ad   : > { %v1473_v22 = vmax.f32 %v1300_v15, %v1398_v16  ;;  %v1448_v24 = vld [vmem:[#allocation2 + $0x2f1] ss:$2 sm:$0xff]  ;;  %1205 = vst [vmem:[#allocation2 + $0x178] sm:$0xff] %v1107_v12  ;;  %1255 = vst [vmem:[#allocation2 + $0x308] sm:$0xff] %v1157_v14  ;;  %v862_v25 = vadd.f32 %v2508_v18, %v861_v21 }
 0x1ae   : > { %v1498_v26 = vmax.f32 %v1350_v17, %v1448_v24  ;;  %v1954_v29 = vpop.f32.mrf.mxu0 }
 0x1af   : > { %1522 = vst [vmem:[#allocation3 + $0xb0] sm:$0xff] %v1473_v22  ;;  %v1108_v31 = vmax.f32 %v862_v25, 0.0  ;;  %v1653_v45 = vld [vmem:[#allocation3 + $0x16c] sm:$0xff] }
 0x1b0   : > { %1547 = vst [vmem:[#allocation3 + $0x178] sm:$0xff] %v1498_v26  ;;  %v864_v33 = vpop.f32.mrf.mxu0 }
 0x1b1   : > { %1206 = vst [vmem:[#allocation2 + $0x180] sm:$0xff] %v1108_v31  ;;  %v865_v34 = vadd.f32 %v2508_v18, %v864_v33 }
 0x1b2   : > { %v1955_v36 = vpop.f32.mrf.mxu0 }
 0x1b3   : > { %v1109_v37 = vmax.f32 %v865_v34, 0.0 }
 0x1b4   : > { %v1302_v58 = vld [vmem:[#allocation2 + $0x170] ss:$2 sm:$0xff]  ;;  %v1400_v38 = vld [vmem:[#allocation2 + $0x171] ss:$2 sm:$0xff]  ;;  %v1352_v40 = vld [vmem:[#allocation2 + $0x300] ss:$2 sm:$0xff] }
 0x1b5   : > { %v1474_v32 = vmax.f32 %v1302_v58, %v1400_v38  ;;  %v1450_v60 = vld [vmem:[#allocation2 + $0x301] ss:$2 sm:$0xff]  ;;  %1207 = vst [vmem:[#allocation2 + $0x188] sm:$0xff] %v1109_v37 }
 0x1b6   : > { %v1499_v62 = vmax.f32 %v1352_v40, %v1450_v60  ;;  %v1598_v50 = vld [vmem:[#allocation3 + $0xb0] sm:$0x3f] }
 0x1b7   : > { %1523 = vst [vmem:[#allocation3 + $0xb8] sm:$0xff] %v1474_v32  ;;  %v1654_v18 = vld [vmem:[#allocation3 + $0x174] sm:$0x3f] }
 0x1b8   : > { %1548 = vst [vmem:[#allocation3 + $0x180] sm:$0xff] %v1499_v62 }
 0x1bc   : > { %v1304_v41 = vld [vmem:[#allocation2 + $0x180] ss:$2 sm:$0xff]  ;;  %v1402_v42 = vld [vmem:[#allocation2 + $0x181] ss:$2 sm:$0xff] }
 0x1bd   : > { %v1475_v44 = vmax.f32 %v1304_v41, %v1402_v42 }
 0x1be   : > { %v1599_v46 = vld [vmem:[#allocation3 + $0xb6] sm:$0xff] }
 0x1bf   : > { %v1601_v47 = vmax.f32 %v1472_v54, %v1599_v46  ;;  %v1655_v48 = vld [vmem:[#allocation3 + $0x17a] sm:$0xff]  ;;  %v1656_v1 = vld [vmem:[#allocation3 + $0x182] sm:$0x3f]  ;;  %1524 = vst [vmem:[#allocation3 + $0xc0] sm:$0xff] %v1475_v44 }
 0x1c0   : > { %v1657_v6 = vmax.f32 %v1653_v45, %v1655_v48  ;;  %v1658_v8 = vmax.f32 %v1654_v18, %v1656_v1 }
 0x1c1   : > { %1603 = vst [vmem:[%s2412_s13 + $0x54] sm:$0xff] %v1601_v47 }
 0x1c2   : > { %1659 = vst [vmem:[%s2412_s13 + $0xb6] sm:$0xff] %v1657_v6  ;;  %1660 = vst [vmem:[%s2412_s13 + $0xbe] sm:$0x3f] %v1658_v8 }
 0x1c6   : > { %v1600_v9 = vld [vmem:[#allocation3 + $0xbe] sm:$0x3f]  ;;  %v1605_v13 = vld [vmem:[#allocation3 + $0xc4] sm:$0xff] }
 0x1c7   : > { %v1602_v20 = vmax.f32 %v1598_v50, %v1600_v9  ;;  %v1609_v53 = vmax.f32 %v1605_v13, %v1607_v49 }
 0x1c9   : > { %1604 = vst [vmem:[%s2412_s13 + $0x5c] sm:$0x3f] %v1602_v20  ;;  %1611 = vst [vmem:[%s2412_s13 + $0x62] sm:$0xff] %v1609_v53 }
 0x1ca PF: > { %s13_s12 = sadd.s32 1, %s2144_s12  }
 0x1cb   : > { %p10_p4 = scmp.ge.s32.totalorder %s13_s12, 4  }
 0x1cd   :  { %12 = sbr.rel (!%p10_p4) target bundleno = 1 (0x1), region = 159 }

// kernel: cnn_forward.5
= control target key start
LH: loop header
LB: loop body
LE: loop exit
PB: predicated region body
PF: predicated region fallthrough
CT: control target
= control target key end

     0   :  { %v828_v39 = vmov 0.0   ;;  %vm829_vm0 = vmmov 0   ;;  %s1050_s1 = inlined_call_operand.vmem [shape: bf16[512,128], index: 1, kind: input, shape index: {}]   ;;  %s1051_s0 = inlined_call_operand.vmem [shape: bf16[8,512], index: 0, kind: input, shape index: {}]   ;;  %s1052_s3 = inlined_call_operand.vmem [shape: bf16[128,128], index: 3, kind: input, shape index: {}]   ;;  %s1053_s5 = inlined_call_operand.vmem [shape: bf16[128,128], index: 5, kind: input, shape index: {}]   ;;  %s1054_s2 = inlined_call_operand.vmem [shape: f32[1,128], index: 2, kind: input, shape index: {}]   ;;  %s1055_s4 = inlined_call_operand.vmem [shape: f32[1,128], index: 4, kind: input, shape index: {}]   ;;  %s1056_s6 = inlined_call_operand.vmem [shape: f32[1,128], index: 6, kind: input, shape index: {}]   ;;  %s1057_s7 = inlined_call_operand.vmem [shape: f32[8,128], index: 7, kind: output, shape index: {}]  }
   0x1   :  { %v776_v0 = vld [vmem:[%s1050_s1 + $0x78] sm:$0xff]   ;;  %v780_v4 = vld [vmem:[%s1050_s1 + $0x70] sm:$0xff]   ;;  %v784_v8 = vld [vmem:[%s1050_s1 + $0x68] sm:$0xff]  }
   0x2   :  { %v777_v1 = vld [vmem:[%s1050_s1 + $0xf8] sm:$0xff]   ;;  %672 = vmatprep.subr.bf16.mxu0 %v776_v0  ;;  %v781_v5 = vld [vmem:[%s1050_s1 + $0xf0] sm:$0xff]   ;;  %v785_v9 = vld [vmem:[%s1050_s1 + $0xe8] sm:$0xff]  }
   0x3   :  { %v778_v2 = vld [vmem:[%s1050_s1 + $0x38] sm:$0xff]   ;;  %694 = vmatprep.subr.bf16.mxu1 %v777_v1  ;;  %v782_v6 = vld [vmem:[%s1050_s1 + $0x30] sm:$0xff]   ;;  %v786_v10 = vld [vmem:[%s1050_s1 + $0x28] sm:$0xff]  }
   0x4   :  { %v779_v3 = vld [vmem:[%s1050_s1 + $0xb8] sm:$0xff]   ;;  %673 = vmatpush3.bf16.msra.mxu0 %v778_v2  ;;  %v783_v7 = vld [vmem:[%s1050_s1 + $0xb0] sm:$0xff]   ;;  %v787_v11 = vld [vmem:[%s1050_s1 + $0xa8] sm:$0xff]  }
   0x5   :  { %695 = vmatpush3.bf16.msra.mxu1 %v779_v3  ;;  %674 = vmatprep.subr.bf16.mxu0 %v780_v4  ;;  %v788_v12 = vld [vmem:[%s1050_s1 + $0x60] sm:$0xff]   ;;  %v792_v16 = vld [vmem:[%s1050_s1 + $0x58] sm:$0xff]   ;;  %v796_v20 = vld [vmem:[%s1050_s1 + $0x50] sm:$0xff]  }
   0x6   :  { %696 = vmatprep.subr.bf16.mxu1 %v781_v5  ;;  %v789_v13 = vld [vmem:[%s1050_s1 + $0xe0] sm:$0xff]   ;;  %v793_v17 = vld [vmem:[%s1050_s1 + $0xd8] sm:$0xff]   ;;  %v797_v21 = vld [vmem:[%s1050_s1 + $0xd0] sm:$0xff]  }
   0x7   :  { %v790_v14 = vld [vmem:[%s1050_s1 + $0x20] sm:$0xff]   ;;  %v794_v18 = vld [vmem:[%s1050_s1 + $0x18] sm:$0xff]   ;;  %v798_v22 = vld [vmem:[%s1050_s1 + $0x10] sm:$0xff]  }
   0x8   :  { %675 = vmatpush3.bf16.msra.mxu0 %v782_v6  ;;  %v791_v15 = vld [vmem:[%s1050_s1 + $0xa0] sm:$0xff]   ;;  %v795_v19 = vld [vmem:[%s1050_s1 + $0x98] sm:$0xff]   ;;  %v799_v23 = vld [vmem:[%s1050_s1 + $0x90] sm:$0xff]  }
   0x9   :  { %697 = vmatpush3.bf16.msra.mxu1 %v783_v7  ;;  %676 = vmatprep.subr.bf16.mxu0 %v784_v8  ;;  %v800_v24 = vld [vmem:[%s1050_s1 + $0x48] sm:$0xff]   ;;  %v804_v28 = vld [vmem:[%s1050_s1 + $0x40] sm:$0xff]   ;;  %v812_v38 = vld [vmem:[%s1052_s3 + $0x38] sm:$0xff]  }
   0xa   :  { %698 = vmatprep.subr.bf16.mxu1 %v785_v9  ;;  %v801_v25 = vld [vmem:[%s1050_s1 + $0xc8] sm:$0xff]   ;;  %v805_v29 = vld [vmem:[%s1050_s1 + $0xc0] sm:$0xff]   ;;  %v813_v40 = vld [vmem:[%s1052_s3 + $0x30] sm:$0xff]  }
   0xb   :  { %v802_v26 = vld [vmem:[%s1050_s1 + $0x8] sm:$0xff]   ;;  %v806_v30 = vld [vmem:[%s1050_s1] sm:$0xff]   ;;  %v816_v43 = vld [vmem:[%s1052_s3 + $0x18] sm:$0xff]  }
   0xc   :  { %677 = vmatpush3.bf16.msra.mxu0 %v786_v10  ;;  %v803_v27 = vld [vmem:[%s1050_s1 + $0x88] sm:$0xff]   ;;  %v807_v31 = vld [vmem:[%s1050_s1 + $0x80] sm:$0xff]   ;;  %v817_v44 = vld [vmem:[%s1052_s3 + $0x10] sm:$0xff]  }
   0xd   :  { %699 = vmatpush3.bf16.msra.mxu1 %v787_v11  ;;  %678 = vmatprep.subr.bf16.mxu0 %v788_v12  ;;  %v27_v32 = vld [vmem:[%s1051_s0] sm:$0xff]  ;;  %v28_v33 = vld [vmem:[%s1051_s0 + $0x8] sm:$0xff]  ;;  %v820_v47 = vld [vmem:[%s1053_s5 + $0x38] sm:$0xff]  }
   0xe   :  { %700 = vmatprep.subr.bf16.mxu1 %v789_v13  ;;  %v618_v34 = vcombine.low %v27_v32, %v27_v32  ;;  %v619_v35 = vcombine.high %v27_v32, %v27_v32  ;;  %v620_v36 = vcombine.low %v28_v33, %v28_v33  ;;  %v621_v37 = vcombine.high %v28_v33, %v28_v33  ;;  %v814_v41 = vld [vmem:[%s1052_s3 + $0x28] sm:$0xff]   ;;  %v815_v42 = vld [vmem:[%s1052_s3 + $0x20] sm:$0xff]   ;;  %v821_v48 = vld [vmem:[%s1053_s5 + $0x30] sm:$0xff]  }
   0xf   :  { %v818_v45 = vld [vmem:[%s1052_s3 + $0x8] sm:$0xff]   ;;  %v819_v46 = vld [vmem:[%s1052_s3] sm:$0xff]   ;;  %v824_v51 = vld [vmem:[%s1053_s5 + $0x18] sm:$0xff]  }
  0x10   :  { %679 = vmatpush3.bf16.msra.mxu0 %v790_v14  ;;  %338 = vmatprep.mubr.bf16.mxu0 %v619_v35  ;;  %v822_v49 = vld [vmem:[%s1053_s5 + $0x28] sm:$0xff]   ;;  %v823_v50 = vld [vmem:[%s1053_s5 + $0x20] sm:$0xff]   ;;  %v825_v52 = vld [vmem:[%s1053_s5 + $0x10] sm:$0xff]  }
  0x11   :  { %701 = vmatpush3.bf16.msra.mxu1 %v791_v15  ;;  %680 = vmatprep.subr.bf16.mxu0 %v792_v16  ;;  %v617_v55 = vld [vmem:[%s1054_s2] ss:$0 sm:$0xff]  ;;  %v826_v4 = vld [vmem:[%s1053_s5 + $0x8] sm:$0xff]  }
  0x12   :  { %702 = vmatprep.subr.bf16.mxu1 %v793_v17  ;;  %378 = vmatprep.mubr.bf16.mxu1 %v621_v37  ;;  %v827_v5 = vld [vmem:[%s1053_s5] sm:$0xff]  }
  0x13   :  { %v654_v6 = vld [vmem:[%s1055_s4] ss:$0 sm:$0xff] }
  0x14   :  { %681 = vmatpush3.bf16.msra.mxu0 %v794_v18  ;;  %v663_v14 = vld [vmem:[%s1056_s6] ss:$0 sm:$0xff] }
  0x15   :  { %703 = vmatpush3.bf16.msra.mxu1 %v795_v19  ;;  %682 = vmatprep.subr.bf16.mxu0 %v796_v20 }
  0x16   :  { %704 = vmatprep.subr.bf16.mxu1 %v797_v21 }
  0x18   :  { %683 = vmatpush3.bf16.msra.mxu0 %v798_v22 }
  0x19   :  { %705 = vmatpush3.bf16.msra.mxu1 %v799_v23  ;;  %684 = vmatprep.subr.bf16.mxu0 %v800_v24 }
  0x1a   :  { %706 = vmatprep.subr.bf16.mxu1 %v801_v25 }
  0x1c   :  { %685 = vmatpush3.bf16.msra.mxu0 %v802_v26 }
  0x1d   :  { %707 = vmatpush3.bf16.msra.mxu1 %v803_v27  ;;  %686 = vmatprep.subr.bf16.mxu0 %v804_v28 }
  0x1e   :  { %708 = vmatprep.subr.bf16.mxu1 %v805_v29 }
  0x20   :  { %687 = vmatpush3.bf16.msra.mxu0 %v806_v30 }
  0x21   :  { %709 = vmatpush3.bf16.msra.mxu1 %v807_v31  ;;  %734 = vmatprep.subr.bf16.mxu0 %v828_v39 }
  0x22   :  { %754 = vmatprep.subr.bf16.mxu1 %v828_v39 }
  0x23   :  { %339 = vmatmul.mubr.bf16.vlgmr.msra.gmra.mxu0 %v618_v34 }
  0x24   :  { %379 = vmatmul.mubr.bf16.vlgmr.msra.gmra.mxu1 %v620_v36  ;;  %735 = vmatpush3.bf16.msra.mxu0 %v812_v38 }
  0x25   :  { %736 = vmatprep.subr.bf16.mxu0 %v828_v39  ;;  %750 = vmatprep.mubr.msk.bf16.mxu0 %vm829_vm0, %v828_v39 }
  0x26   :  { %770 = vmatprep.mubr.msk.bf16.mxu1 %vm829_vm0, %v828_v39  ;;  %755 = vmatpush3.bf16.msra.mxu1 %v820_v47 }
  0x27   :  { %756 = vmatprep.subr.bf16.mxu1 %v828_v39 }
  0x28   :  { %737 = vmatpush3.bf16.msra.mxu0 %v813_v40 }
  0x29   :  { %738 = vmatprep.subr.bf16.mxu0 %v828_v39 }
  0x2a   :  { %757 = vmatpush3.bf16.msra.mxu1 %v821_v48 }
  0x2b   :  { %758 = vmatprep.subr.bf16.mxu1 %v828_v39 }
  0x2c   :  { %739 = vmatpush3.bf16.msra.mxu0 %v814_v41 }
  0x2d   :  { %740 = vmatprep.subr.bf16.mxu0 %v828_v39 }
  0x2e   :  { %759 = vmatpush3.bf16.msra.mxu1 %v822_v49 }
  0x2f   :  { %760 = vmatprep.subr.bf16.mxu1 %v828_v39 }
  0x30   :  { %741 = vmatpush3.bf16.msra.mxu0 %v815_v42 }
  0x31   :  { %742 = vmatprep.subr.bf16.mxu0 %v828_v39 }
  0x32   :  { %761 = vmatpush3.bf16.msra.mxu1 %v823_v50 }
  0x33   :  { %762 = vmatprep.subr.bf16.mxu1 %v828_v39 }
  0x34   :  { %743 = vmatpush3.bf16.msra.mxu0 %v816_v43 }
  0x35   :  { %744 = vmatprep.subr.bf16.mxu0 %v828_v39 }
  0x36   :  { %763 = vmatpush3.bf16.msra.mxu1 %v824_v51 }
  0x37   :  { %764 = vmatprep.subr.bf16.mxu1 %v828_v39 }
  0x38   :  { %745 = vmatpush3.bf16.msra.mxu0 %v817_v44 }
  0x39   :  { %746 = vmatprep.subr.bf16.mxu0 %v828_v39 }
  0x3a   :  { %765 = vmatpush3.bf16.msra.mxu1 %v825_v52 }
  0x3b   :  { %766 = vmatprep.subr.bf16.mxu1 %v828_v39 }
  0x3c   :  { %747 = vmatpush3.bf16.msra.mxu0 %v818_v45 }
  0x3d   :  { %748 = vmatprep.subr.bf16.mxu0 %v828_v39 }
  0x3e   :  { %767 = vmatpush3.bf16.msra.mxu1 %v826_v4 }
  0x3f   :  { %768 = vmatprep.subr.bf16.mxu1 %v828_v39 }
  0x40   :  { %749 = vmatpush3.bf16.msra.mxu0 %v819_v46 }
  0x42   :  { %769 = vmatpush3.bf16.msra.mxu1 %v827_v5 }
  0xe3   :  { %v688_v53 = vpop.f32.mrf.mxu0 }
  0xe4   :  { %v710_v54 = vpop.f32.mrf.mxu1 }
  0xe5   :  { %v689_v56 = vpop.f32.mrf.mxu0 }
  0xe6   :  { %v711_v57 = vpop.f32.mrf.mxu1  ;;  %v690_v58 = vadd.f32 %v689_v56, %v688_v53 }
  0xe7   :  { %v691_v59 = vpop.f32.mrf.mxu0  ;;  %v712_v62 = vadd.f32 %v711_v57, %v710_v54 }
  0xe8   :  { %v713_v60 = vpop.f32.mrf.mxu1  ;;  %v341_v61 = vadd.f32 %v690_v58, %v617_v55 }
  0xe9   :  { %v692_v63 = vpop.f32.mrf.mxu0 }
  0xea   :  { %v714_v0 = vpop.f32.mrf.mxu1  ;;  %v381_v1 = vadd.f32 %v712_v62, %v341_v61 }
  0xec   :  { %v386_v2 = vmax.f32 %v381_v1, 0.0 }
  0xee   :  { %v387_v3 = vpack.c.bf16 %v386_v2, %v386_v2 }
  0xf0   :  { %751 = vmatmul.mubr.bf16.vlgmr.msra.gmra.mxu0 %v387_v3 }
 0x1b0   :  { %v493_v7 = vpop.f32.mrf.mxu0 }
 0x1b1   :  { %v494_v8 = vadd.f32 %v654_v6, %v493_v7 }
 0x1b2   :  { %v752_v9 = vpop.f32.mrf.mxu0 }
 0x1b3   :  { %v499_v10 = vmax.f32 %v494_v8, 0.0 }
 0x1b4   :  { %v496_v11 = vpop.f32.mrf.mxu0 }
 0x1b5   :  { %v500_v12 = vpack.c.bf16 %v499_v10, %v499_v10 }
 0x1b6   :  { %v753_v13 = vpop.f32.mrf.mxu0 }
 0x1b7   :  { %771 = vmatmul.mubr.bf16.vlgmr.msra.gmra.mxu1 %v500_v12 }
 0x277   :  { %v606_v15 = vpop.f32.mrf.mxu1 }
 0x278   :  { %v607_v16 = vadd.f32 %v663_v14, %v606_v15 }
 0x279   :  { %v772_v17 = vpop.f32.mrf.mxu1 }
 0x27a   :  { %612 = vst [vmem:[%s1057_s7] sm:$0xff] %v607_v16 }
 0x27b   :  { %v609_v18 = vpop.f32.mrf.mxu1 }
 0x27d   :  { %v773_v19 = vpop.f32.mrf.mxu1 }

// kernel: cnn_forward.4
= control target key start
LH: loop header
LB: loop body
LE: loop exit
PB: predicated region body
PF: predicated region fallthrough
CT: control target
= control target key end

     0   :  { %s806_s12 = smov 0   ;;  %s908_s0 = inlined_call_operand.vmem [shape: bf16[2,100,256], index: 0, kind: input, shape index: {}]   ;;  %s909_s1 = inlined_call_operand.vmem [shape: bf16[256,128], index: 1, kind: input, shape index: {}]   ;;  %s910_s2 = inlined_call_operand.vmem [shape: f32[1,128], index: 2, kind: input, shape index: {}]   ;;  %s911_s3 = inlined_call_operand.vmem [shape: f32[2,25,128], index: 3, kind: output, shape index: {}]  }
   0x1 LB: > { %s617_s13 = sadd.s32 4294967295, %s784_s12   ;;  %p621_p0 = scmp.ge.s32.totalorder %s784_s12, 1  ;;  %s784_s12 = sphi %s806_s12, %s13_s12  }
   0x2   : > { %p137_p1 = scmp.lt.s32.totalorder %s784_s12, 3 }
   0x4   : > { %p138_p2 = pnand %p621_p0, %p137_p1 }
   0x5   : > { %p161_p3 = scmp.lt.s32.totalorder (!%p138_p2), %s617_s13, 1 }
   0x6   : > { %141 = sbr.rel (%p138_p2) target bundleno = 294 (0x126), region = 32 }
   0xb   : > { %v742_v0 = vld [vmem:[%s909_s1 + $0x78] sm:$0xff]   ;;  %v744_v2 = vld [vmem:[%s909_s1 + $0x70] sm:$0xff]   ;;  %v746_v4 = vld [vmem:[%s909_s1 + $0x68] sm:$0xff]   ;;  %s913_s13 = smov (!%p161_p3, %s617_s13), 1 }
   0xc   : > { %v743_v1 = vld [vmem:[%s909_s1 + $0x38] sm:$0xff]   ;;  %659 = vmatprep.subr.bf16.mxu0 %v742_v0  ;;  %717 = vmatprep.subr.bf16.mxu1 %v742_v0  ;;  %v745_v3 = vld [vmem:[%s909_s1 + $0x30] sm:$0xff]   ;;  %v747_v5 = vld [vmem:[%s909_s1 + $0x28] sm:$0xff]   ;;  %s733_s28 = smul.u32 104, %s913_s13  ;;  %s658_s27 = sshll.u32 %s913_s13, 5 }
   0xd   : > { %660 = vmatpush3.bf16.msra.mxu0 %v743_v1  ;;  %725 = vmatpush3.bf16.msra.mxu1 %v743_v1  ;;  %v748_v6 = vld [vmem:[%s909_s1 + $0x60] sm:$0xff]   ;;  %v750_v8 = vld [vmem:[%s909_s1 + $0x58] sm:$0xff]   ;;  %v752_v10 = vld [vmem:[%s909_s1 + $0x50] sm:$0xff]   ;;  %s170_s30 = scalar_lea.vmem %s911_s3, %s658_s27 }
   0xe   : > { %661 = vmatprep.subr.bf16.mxu0 %v744_v2  ;;  %718 = vmatprep.subr.bf16.mxu1 %v744_v2  ;;  %v749_v7 = vld [vmem:[%s909_s1 + $0x20] sm:$0xff]   ;;  %s847_s8 = scalar_lea.vmem %s908_s0, %s733_s28  ;;  %v751_v9 = vld [vmem:[%s909_s1 + $0x18] sm:$0xff]   ;;  %v753_v13 = vld [vmem:[%s909_s1 + $0x10] sm:$0xff]  }
   0xf   : > { %v760_v11 = vld [vmem:[%s847_s8 + $0x4] ss:$8 sps:$4 sm:$0xff]   ;;  %v758_v18 = vld [vmem:[%s847_s8] ss:$8 sps:$4 sm:$0xff]   ;;  %v764_v20 = vld [vmem:[%s847_s8 + $0x14] ss:$8 sps:$4 sm:$0xff]  }
  0x10   : > { %v763_v12 = vld [vmem:[%s847_s8 + $0x44] ss:$8 sps:$4 sm:$0xff]   ;;  %419 = vmatprep.mubr.bf16.mxu0 %v760_v11  ;;  %v761_v19 = vld [vmem:[%s847_s8 + $0x40] ss:$8 sps:$4 sm:$0xff]   ;;  %v767_v21 = vld [vmem:[%s847_s8 + $0x54] ss:$8 sps:$4 sm:$0xff]  }
  0x11   : > { %662 = vmatpush3.bf16.msra.mxu0 %v745_v3  ;;  %726 = vmatpush3.bf16.msra.mxu1 %v745_v3  ;;  %v754_v14 = vld [vmem:[%s909_s1 + $0x48] sm:$0xff]   ;;  %v756_v16 = vld [vmem:[%s909_s1 + $0x40] sm:$0xff]   ;;  %v766_v23 = vld [vmem:[%s847_s8 + $0x10] ss:$8 sps:$4 sm:$0xff]  }
  0x12   : > { %663 = vmatprep.subr.bf16.mxu0 %v746_v4  ;;  %719 = vmatprep.subr.bf16.mxu1 %v746_v4  ;;  %v755_v15 = vld [vmem:[%s909_s1 + $0x8] sm:$0xff]   ;;  %v757_v17 = vld [vmem:[%s909_s1] sm:$0xff]   ;;  %v769_v24 = vld [vmem:[%s847_s8 + $0x50] ss:$8 sps:$4 sm:$0xff]  }
  0x13   : > { %451 = vmatprep.mubr.bf16.mxu1 %v763_v12  ;;  %v184_v22 = vld [vmem:[%s847_s8 + $0x60] sm:$0x33]  ;;  %v775_v29 = vld [vmem:[%s847_s8 + $0x34] ss:$8 sps:$4 sm:$0xff]   ;;  %v777_v30 = vld [vmem:[%s847_s8 + $0x30] ss:$8 sps:$4 sm:$0xff]  }
  0x14   : > { %v770_v25 = vld [vmem:[%s847_s8 + $0x24] ss:$8 sps:$4 sm:$0xff]   ;;  %v639_v26 = vcombine.high %v184_v22, %v184_v22  ;;  %v772_v27 = vld [vmem:[%s847_s8 + $0x20] ss:$8 sps:$4 sm:$0xff]   ;;  %v638_v28 = vcombine.low %v184_v22, %v184_v22 }
  0x15   : > { %664 = vmatpush3.bf16.msra.mxu0 %v747_v5  ;;  %727 = vmatpush3.bf16.msra.mxu1 %v747_v5  ;;  %v886_v33 = vld [vmem:[%s910_s2] ss:$0 sm:$0xff] }
  0x16   : > { %665 = vmatprep.subr.bf16.mxu0 %v748_v6  ;;  %720 = vmatprep.subr.bf16.mxu1 %v748_v6 }
  0x19   : > { %666 = vmatpush3.bf16.msra.mxu0 %v749_v7  ;;  %728 = vmatpush3.bf16.msra.mxu1 %v749_v7 }
  0x1a   : > { %667 = vmatprep.subr.bf16.mxu0 %v750_v8  ;;  %721 = vmatprep.subr.bf16.mxu1 %v750_v8 }
  0x1d   : > { %668 = vmatpush3.bf16.msra.mxu0 %v751_v9  ;;  %729 = vmatpush3.bf16.msra.mxu1 %v751_v9 }
  0x1e   : > { %669 = vmatprep.subr.bf16.mxu0 %v752_v10  ;;  %722 = vmatprep.subr.bf16.mxu1 %v752_v10 }
  0x21   : > { %670 = vmatpush3.bf16.msra.mxu0 %v753_v13  ;;  %730 = vmatpush3.bf16.msra.mxu1 %v753_v13 }
  0x22   : > { %671 = vmatprep.subr.bf16.mxu0 %v754_v14  ;;  %723 = vmatprep.subr.bf16.mxu1 %v754_v14 }
  0x25   : > { %672 = vmatpush3.bf16.msra.mxu0 %v755_v15  ;;  %731 = vmatpush3.bf16.msra.mxu1 %v755_v15 }
  0x26   : > { %673 = vmatprep.subr.bf16.mxu0 %v756_v16  ;;  %724 = vmatprep.subr.bf16.mxu1 %v756_v16 }
  0x29   : > { %674 = vmatpush3.bf16.msra.mxu0 %v757_v17  ;;  %732 = vmatpush3.bf16.msra.mxu1 %v757_v17 }
  0x2c   : > { %420 = vmatmul.mubr.bf16.vlgmr.msra.gmra.mxu0 %v758_v18  ;;  %452 = vmatmul.mubr.bf16.vlgmr.msra.gmra.mxu1 %v761_v19 }
  0x2d   : > { %427 = vmatprep.mubr.bf16.mxu0 %v764_v20  ;;  %459 = vmatprep.mubr.bf16.mxu1 %v767_v21 }
  0x34   : > { %428 = vmatmul.mubr.bf16.gmra.mxu0 %v766_v23  ;;  %460 = vmatmul.mubr.bf16.gmra.mxu1 %v769_v24 }
  0x35   : > { %435 = vmatprep.mubr.bf16.mxu0 %v770_v25  ;;  %467 = vmatprep.mubr.bf16.mxu1 %v639_v26 }
  0x3c   : > { %436 = vmatmul.mubr.bf16.gmra.mxu0 %v772_v27  ;;  %468 = vmatmul.mubr.bf16.gmra.mxu1 %v638_v28 }
  0x3d   : > { %443 = vmatprep.mubr.bf16.mxu0 %v775_v29 }
  0x44   : > { %444 = vmatmul.mubr.bf16.gmra.mxu0 %v777_v30 }
  0xec   : > { %v675_v31 = vpop.f32.mrf.mxu0  ;;  %v699_v32 = vpop.f32.mrf.mxu1 }
  0xee   : > { %v676_v34 = vpop.f32.mrf.mxu0  ;;  %v700_v35 = vpop.f32.mrf.mxu1 }
  0xef   : > { %v677_v36 = vadd.f32 %v676_v34, %v675_v31  ;;  %v701_v37 = vadd.f32 %v700_v35, %v699_v32 }
  0xf0   : > { %v678_v38 = vpop.f32.mrf.mxu0  ;;  %v702_v39 = vpop.f32.mrf.mxu1 }
  0xf1   : > { %v422_v40 = vadd.f32 %v677_v36, %v886_v33  ;;  %v454_v41 = vadd.f32 %v701_v37, %v886_v33 }
  0xf2   : > { %v679_v42 = vpop.f32.mrf.mxu0  ;;  %v703_v43 = vpop.f32.mrf.mxu1 }
  0xf3   : > { %v475_v44 = vmax.f32 %v422_v40, 0.0  ;;  %v483_v45 = vmax.f32 %v454_v41, 0.0  ;;  %v680_v46 = vadd.f32 %v679_v42, %v678_v38  ;;  %v704_v47 = vadd.f32 %v703_v43, %v702_v39 }
  0xf4   : > { %v681_v48 = vpop.f32.mrf.mxu0  ;;  %v705_v49 = vpop.f32.mrf.mxu1 }
  0xf5   : > { %488 = vst [vmem:[#allocation2] sm:$0xff] %v475_v44  ;;  %496 = vst [vmem:[#allocation2 + $0x40] sm:$0xff] %v483_v45  ;;  %v425_v50 = vadd.f32 %v680_v46, %v886_v33  ;;  %v457_v51 = vadd.f32 %v704_v47, %v886_v33 }
  0xf6   : > { %v682_v52 = vpop.f32.mrf.mxu0  ;;  %v706_v53 = vpop.f32.mrf.mxu1 }
  0xf7   : > { %v476_v54 = vmax.f32 %v425_v50, 0.0  ;;  %v484_v55 = vmax.f32 %v457_v51, 0.0  ;;  %v683_v56 = vadd.f32 %v682_v52, %v681_v48  ;;  %v707_v57 = vadd.f32 %v706_v53, %v705_v49 }
  0xf8   : > { %v684_v58 = vpop.f32.mrf.mxu0  ;;  %v708_v59 = vpop.f32.mrf.mxu1 }
  0xf9   : > { %489 = vst [vmem:[#allocation2 + $0x8] sm:$0xff] %v476_v54  ;;  %497 = vst [vmem:[#allocation2 + $0x48] sm:$0xff] %v484_v55  ;;  %v430_v60 = vadd.f32 %v683_v56, %v886_v33  ;;  %v462_v61 = vadd.f32 %v707_v57, %v886_v33 }
  0xfa   : > { %v685_v62 = vpop.f32.mrf.mxu0  ;;  %v709_v63 = vpop.f32.mrf.mxu1 }
  0xfb   : > { %v477_v0 = vmax.f32 %v430_v60, 0.0  ;;  %v485_v1 = vmax.f32 %v462_v61, 0.0  ;;  %v686_v2 = vadd.f32 %v685_v62, %v684_v58  ;;  %v710_v3 = vadd.f32 %v709_v63, %v708_v59 }
  0xfc   : > { %v687_v4 = vpop.f32.mrf.mxu0  ;;  %v711_v5 = vpop.f32.mrf.mxu1 }
  0xfd   : > { %490 = vst [vmem:[#allocation2 + $0x10] sm:$0xff] %v477_v0  ;;  %498 = vst [vmem:[#allocation2 + $0x50] sm:$0xff] %v485_v1  ;;  %v433_v6 = vadd.f32 %v686_v2, %v886_v33  ;;  %v465_v7 = vadd.f32 %v710_v3, %v886_v33 }
  0xfe   : > { %v688_v8 = vpop.f32.mrf.mxu0  ;;  %v712_v9 = vpop.f32.mrf.mxu1 }
  0xff   : > { %v478_v10 = vmax.f32 %v433_v6, 0.0  ;;  %v486_v11 = vmax.f32 %v465_v7, 0.0  ;;  %v689_v12 = vadd.f32 %v688_v8, %v687_v4  ;;  %v713_v13 = vadd.f32 %v712_v9, %v711_v5 }
 0x100   : > { %v501_v14 = vld [vmem:[#allocation2] ss:$2 sm:$0xff]  ;;  %v515_v15 = vld [vmem:[#allocation2 + $0x1] ss:$2 sm:$0xff]  ;;  %v690_v17 = vpop.f32.mrf.mxu0  ;;  %v714_v18 = vpop.f32.mrf.mxu1 }
 0x101   : > { %v509_v16 = vld [vmem:[#allocation2 + $0x40] ss:$2 sm:$0xff]  ;;  %v528_v19 = vmax.f32 %v501_v14, %v515_v15  ;;  %v523_v20 = vld [vmem:[#allocation2 + $0x41] ss:$2 sm:$0xff]  ;;  %491 = vst [vmem:[#allocation2 + $0x18] sm:$0xff] %v478_v10  ;;  %499 = vst [vmem:[#allocation2 + $0x58] sm:$0xff] %v486_v11  ;;  %v438_v21 = vadd.f32 %v689_v12, %v886_v33  ;;  %v470_v22 = vadd.f32 %v713_v13, %v886_v33 }
 0x102   : > { %v532_v23 = vmax.f32 %v509_v16, %v523_v20  ;;  %v691_v24 = vpop.f32.mrf.mxu0  ;;  %v715_v25 = vpop.f32.mrf.mxu1 }
 0x103   : > { %535 = vst [vmem:[#allocation3] sm:$0xff] %v528_v19  ;;  %v479_v26 = vmax.f32 %v438_v21, 0.0  ;;  %v487_v27 = vmax.f32 %v470_v22, 0.0  ;;  %v692_v28 = vadd.f32 %v691_v24, %v690_v17 }
 0x104   : > { %539 = vst [vmem:[#allocation3 + $0x20] sm:$0xff] %v532_v23  ;;  %v693_v29 = vpop.f32.mrf.mxu0 }
 0x105   : > { %492 = vst [vmem:[#allocation2 + $0x20] sm:$0xff] %v479_v26  ;;  %500 = vst [vmem:[#allocation2 + $0x60] sm:$0xf] %v487_v27  ;;  %v441_v30 = vadd.f32 %v692_v28, %v886_v33 }
 0x106   : > { %v694_v31 = vpop.f32.mrf.mxu0 }
 0x107   : > { %v480_v32 = vmax.f32 %v441_v30, 0.0  ;;  %v695_v34 = vadd.f32 %v694_v31, %v693_v29 }
 0x108   : > { %v503_v35 = vld [vmem:[#allocation2 + $0x10] ss:$2 sm:$0xff]  ;;  %v517_v36 = vld [vmem:[#allocation2 + $0x11] ss:$2 sm:$0xff]  ;;  %v696_v38 = vpop.f32.mrf.mxu0 }
 0x109   : > { %v511_v37 = vld [vmem:[#allocation2 + $0x50] ss:$2 sm:$0xff]  ;;  %v529_v39 = vmax.f32 %v503_v35, %v517_v36  ;;  %v525_v40 = vld [vmem:[#allocation2 + $0x51] ss:$2 sm:$0xff]  ;;  %493 = vst [vmem:[#allocation2 + $0x28] sm:$0xff] %v480_v32  ;;  %v446_v41 = vadd.f32 %v695_v34, %v886_v33 }
 0x10a   : > { %v533_v42 = vmax.f32 %v511_v37, %v525_v40  ;;  %v697_v43 = vpop.f32.mrf.mxu0  ;;  %v542_v54 = vld [vmem:[#allocation3] sm:$0x1f] }
 0x10b   : > { %536 = vst [vmem:[#allocation3 + $0x8] sm:$0xff] %v529_v39  ;;  %v481_v44 = vmax.f32 %v446_v41, 0.0  ;;  %v698_v45 = vadd.f32 %v697_v43, %v696_v38  ;;  %v555_v1 = vld [vmem:[#allocation3 + $0x23] sm:$0x1f] }
 0x10c   : > { %540 = vst [vmem:[#allocation3 + $0x28] sm:$0xff] %v533_v42  ;;  %v513_v46 = vld [vmem:[#allocation2 + $0x60] ss:$2 sm:$0x3] }
 0x10d   : > { %v527_v47 = vld [vmem:[#allocation2 + $0x61] ss:$2 sm:$0x3]  ;;  %494 = vst [vmem:[#allocation2 + $0x30] sm:$0xff] %v481_v44  ;;  %v449_v49 = vadd.f32 %v698_v45, %v886_v33 }
 0x10e   : > { %v534_v48 = vmax.f32 %v513_v46, %v527_v47 }
 0x10f   : > { %v482_v50 = vmax.f32 %v449_v49, 0.0 }
 0x110   : > { %541 = vst [vmem:[#allocation3 + $0x30] sm:$0x3] %v534_v48  ;;  %v505_v51 = vld [vmem:[#allocation2 + $0x20] ss:$2 sm:$0xff]  ;;  %v519_v52 = vld [vmem:[#allocation2 + $0x21] ss:$2 sm:$0xff] }
 0x111   : > { %v530_v53 = vmax.f32 %v505_v51, %v519_v52  ;;  %495 = vst [vmem:[#allocation2 + $0x38] sm:$0xff] %v482_v50 }
 0x112   : > { %v543_v55 = vld [vmem:[#allocation3 + $0x5] sm:$0x1f]  ;;  %v546_v62 = vld [vmem:[#allocation3 + $0xa] sm:$0x1f] }
 0x113   : > { %v544_v56 = vmax.f32 %v542_v54, %v543_v55  ;;  %537 = vst [vmem:[#allocation3 + $0x10] sm:$0xff] %v530_v53  ;;  %v558_v57 = vld [vmem:[#allocation3 + $0x28] sm:$0x1f] }
 0x115   : > { %545 = vst [vmem:[%s170_s30] sm:$0x1f] %v544_v56 }
 0x117   : > { %v559_v58 = vld [vmem:[#allocation3 + $0x2d] sm:$0x1f] }
 0x118   : > { %v560_v59 = vmax.f32 %v558_v57, %v559_v58  ;;  %v507_v33 = vld [vmem:[#allocation2 + $0x30] ss:$2 sm:$0xff]  ;;  %v521_v60 = vld [vmem:[#allocation2 + $0x31] ss:$2 sm:$0xff] }
 0x119   : > { %v531_v61 = vmax.f32 %v507_v33, %v521_v60 }
 0x11a   : > { %561 = vst [vmem:[%s170_s30 + $0x14] sm:$0x1f] %v560_v59  ;;  %v547_v63 = vld [vmem:[#allocation3 + $0xf] sm:$0x1f] }
 0x11b   : > { %v548_v0 = vmax.f32 %v546_v62, %v547_v63  ;;  %538 = vst [vmem:[#allocation3 + $0x18] sm:$0xff] %v531_v61 }
 0x11d   : > { %549 = vst [vmem:[%s170_s30 + $0x5] sm:$0x1f] %v548_v0 }
 0x122   : > { %v550_v2 = vld [vmem:[#allocation3 + $0x14] sm:$0x1f]  ;;  %v551_v3 = vld [vmem:[#allocation3 + $0x19] sm:$0x1f]  ;;  %v554_v4 = vld [vmem:[#allocation3 + $0x1e] sm:$0x1f] }
 0x123   : > { %v552_v5 = vmax.f32 %v550_v2, %v551_v3  ;;  %v556_v6 = vmax.f32 %v554_v4, %v555_v1 }
 0x125   : > { %553 = vst [vmem:[%s170_s30 + $0xa] sm:$0x1f] %v552_v5  ;;  %557 = vst [vmem:[%s170_s30 + $0xf] sm:$0x1f] %v556_v6 }
 0x126 PF: > { %s13_s12 = sadd.s32 1, %s784_s12  }
 0x127   : > { %p10_p4 = scmp.ge.s32.totalorder %s13_s12, 4  }
 0x129   :  { %12 = sbr.rel (!%p10_p4) target bundleno = 1 (0x1), region = 75 }

</bundles_post_ra>
